<compile_context>
chip_gen: v7x
topology: tpu7x:2x2x1
jax: 0.10.0
libtpu: 0.0.40
codegen_flags: <defaults>
</compile_context>

<pallas_src>
import functools

import jax
import jax.numpy as jnp
from jax.experimental import pallas as pl
from jax.experimental.pallas import tpu as pltpu


LANE = 128      # lane tile width
SUBLANE = 8     # f32 sublane tile height


def _round_up(x, m):
    return ((x + m - 1) // m) * m


def _sigmoid(x):
    # exact: sigmoid(x) = 0.5 * (tanh(x/2) + 1) — one EUP op, no exp + divide.
    return 0.5 * (jnp.tanh(0.5 * x) + 1.0)


# ----------------------------- fused Pallas kernel ---------------------------

def fused_var_len_lstm_kernel(x0_ref, wih0_ref, wihh_ref, whh_ref, b_ref,
                              vl_ref, fcw_ref, fcb_ref, out_ref,
                              xproj_ref, seq_ref):
    """One grid step = (batch tile nb, layer l); layer axis is innermost.

    x0_ref   : [T*Bt, Fp]  bf16   layer-0 input for this batch tile (row = t*Bt + b)
    wih0_ref : [Fp, G]     bf16   layer-0 input->gates weights (VMEM resident)
    wihh_ref : [Hh, G]     bf16   layer-l input->gates weights, l>=1 (streamed;
                                  block 0 is a never-read dummy)
    whh_ref  : [Hh, G]     bf16   layer-l hidden->gates weights (streamed)
    b_ref    : [1, G]      f32    layer-l  b_ih + b_hh (streamed)
    vl_ref   : [Bt, 1]     int32  valid lengths (padded rows = 1)
    fcw_ref  : [Hh, Op]    bf16   fc weight, pre-transposed + zero-padded
    fcb_ref  : [1, Op]     f32
    out_ref  : [Bt, Op]    f32    written only at the last layer
    xproj_ref: [T*Bt, G]   f32    scratch: hoisted input projection (+ bias)
    seq_ref  : [T*Bt, Hh]  f32    scratch: this layer's hidden sequence (carried
                                  across the layer grid axis, never leaves VMEM)
    Gate order along G = 4*Hh: i, f, g, o (PyTorch).  For 4*H <= 128 the four
    gate blocks are packed into a single 128-lane vreg (Hh = H).
    """
    l = pl.program_id(1)
    n_layers = pl.num_programs(1)

    Hh = whh_ref.shape[0]
    Bt = vl_ref.shape[0]
    T = seq_ref.shape[0] // Bt

    bias = b_ref[...]                                     # [1, G] f32

    # Input projection hoisted out of the serial recurrence: one big MXU matmul
    # over all timesteps (bf16 operands, f32 accumulation), bias folded in here.
    @pl.when(l == 0)
    def _():
        xproj_ref[...] = bias + jnp.dot(
            x0_ref[...], wih0_ref[...], preferred_element_type=jnp.float32)

    @pl.when(l > 0)
    def _():
        xproj_ref[...] = bias + jnp.dot(
            seq_ref[...].astype(jnp.bfloat16), wihh_ref[...],
            preferred_element_type=jnp.float32)

    whh = whh_ref[...]                                    # [Hh, G] bf16, stays in vregs
    vl_minus1 = vl_ref[...] - 1                           # [Bt, 1] int32

    h = jnp.zeros((Bt, Hh), jnp.float32)
    c = jnp.zeros((Bt, Hh), jnp.float32)
    h_last = jnp.zeros((Bt, Hh), jnp.float32)

    # T is a small compile-time constant: fully unrolled so the LLO scheduler
    # can overlap EUP transcendentals with the next step's MXU push.  Per-step
    # gates come from / go to VMEM refs, so vreg live ranges stay bounded.
    for t in range(T):
        gates = xproj_ref[pl.ds(t * Bt, Bt), :] + jnp.dot(
            h.astype(jnp.bfloat16), whh, preferred_element_type=jnp.float32)
        i_g = _sigmoid(gates[:, 0 * Hh:1 * Hh])
        f_g = _sigmoid(gates[:, 1 * Hh:2 * Hh])
        g_g = jnp.tanh(gates[:, 2 * Hh:3 * Hh])
        o_g = _sigmoid(gates[:, 3 * Hh:4 * Hh])
        c = f_g * c + i_g * g_g
        h = o_g * jnp.tanh(c)
        seq_ref[pl.ds(t * Bt, Bt), :] = h                 # next layer's input
        # packed-sequence "gather at valid_len-1" as an in-kernel masked select
        h_last = jnp.where(vl_minus1 == t, h, h_last)

    @pl.when(l == n_layers - 1)
    def _():
        out_ref[...] = fcb_ref[...] + jnp.dot(
            h_last.astype(jnp.bfloat16), fcw_ref[...],
            preferred_element_type=jnp.float32)


# ------------------------------ weight packing --------------------------------

def pack_variable_len_rnn_params(lstm_params, fc_w, fc_b):
    """One-time weight packing (hoisted out of the per-forward jit).

    PyTorch LSTM weights -> transposed, gate-packed, zero-padded bf16 arrays:
      * gate blocks of width Hh along the last axis in PyTorch order i,f,g,o;
        Hh = H when 4*H <= 128 (all four gates share one vreg), else
        Hh = round_up(H, 128) (lane-aligned gate blocks).
      * layer-0 W_ih kept separate (K = Fp = padded input size) from layers>=1
        W_ih (K = Hh).
      * b_ih + b_hh folded into a single f32 bias per layer.
    Padding is always zero, so padded hidden units stay exactly 0.
    """
    L = len(lstm_params)
    H = lstm_params[0][1].shape[1]
    I = lstm_params[0][0].shape[1]
    O = fc_w.shape[0]

    Hh = H if 4 * H <= LANE else _round_up(H, LANE)
    G = 4 * Hh
    Fp = _round_up(max(I, 1), LANE)
    Op = _round_up(max(O, 1), LANE)

    def prep(w_ih, w_hh, b_ih, b_hh, in_pad):
        Hl = w_hh.shape[1]
        Il = w_ih.shape[1]
        wih_p = jnp.zeros((in_pad, G), jnp.float32)
        whh_p = jnp.zeros((Hh, G), jnp.float32)
        b_p = jnp.zeros((1, G), jnp.float32)
        b_sum = (b_ih + b_hh).astype(jnp.float32)
        for k in range(4):                                # PyTorch order: i, f, g, o
            wih_p = wih_p.at[:Il, k * Hh:k * Hh + Hl].set(
                w_ih[k * Hl:(k + 1) * Hl, :].astype(jnp.float32).T)
            whh_p = whh_p.at[:Hl, k * Hh:k * Hh + Hl].set(
                w_hh[k * Hl:(k + 1) * Hl, :].astype(jnp.float32).T)
            b_p = b_p.at[0, k * Hh:k * Hh + Hl].set(b_sum[k * Hl:(k + 1) * Hl])
        return wih_p, whh_p, b_p

    wih0 = None
    wihh_l, whh_l, b_l = [], [], []
    for layer, (w_ih, w_hh, b_ih, b_hh) in enumerate(lstm_params):
        wi, wh, bb = prep(w_ih, w_hh, b_ih, b_hh, Fp if layer == 0 else Hh)
        if layer == 0:
            wih0 = wi
            wihh_l.append(jnp.zeros((Hh, G), jnp.float32))   # dummy block, never read
        else:
            wihh_l.append(wi)
        whh_l.append(wh)
        b_l.append(bb)

    fcw = jnp.zeros((Hh, Op), jnp.float32).at[:H, :O].set(fc_w.astype(jnp.float32).T)
    fcb = jnp.zeros((1, Op), jnp.float32).at[0, :O].set(fc_b.astype(jnp.float32))

    return dict(
        wih0=wih0.astype(jnp.bfloat16),                   # [Fp, G]
        wihh=jnp.stack(wihh_l).astype(jnp.bfloat16),      # [L, Hh, G]
        whh=jnp.stack(whh_l).astype(jnp.bfloat16),        # [L, Hh, G]
        b=jnp.stack(b_l),                                 # [L, 1, G] f32
        fcw=fcw.astype(jnp.bfloat16),                     # [Hh, Op]
        fcb=fcb,                                          # [1, Op]  f32
    )


# ------------------------------- forward wrapper -------------------------------

@functools.partial(jax.jit, static_argnames=("out_dim", "batch_tile"))
def variable_len_rnn_forward(x, valid_len, packed, *, out_dim, batch_tile=8):
    """Forward pass matching Variable_Len_RNN.forward (eval mode).

    x         : [B, T, input_size]  (PyTorch batch_first layout)
    valid_len : [B] int, valid lengths per batch element
    packed    : output of pack_variable_len_rnn_params (packed once, reused)
    Returns   : [B, out_dim]
    """
    wih0, wihh, whh, b = packed["wih0"], packed["wihh"], packed["whh"], packed["b"]
    fcw, fcb = packed["fcw"], packed["fcb"]

    B, T, I = x.shape
    L, Hh, G = whh.shape
    Fp = wih0.shape[0]
    Op = fcw.shape[1]

    Bt = _round_up(max(batch_tile, SUBLANE), SUBLANE)     # sublane-aligned batch tile
    Bp = _round_up(max(B, 1), Bt)
    NB = Bp // Bt

    # layer-0 input: [B,T,I] batch_first -> per-tile time-major [NB, T*Bt, Fp]
    # (row = t*Bt + b), zero-padded; padding never perturbs the real computation.
    x_tm = jnp.swapaxes(x.astype(jnp.float32), 0, 1)                  # [T, B, I]
    x_pad = jnp.zeros((T, Bp, Fp), jnp.float32).at[:, :B, :I].set(x_tm)
    x_pad = (x_pad.reshape(T, NB, Bt, Fp).transpose(1, 0, 2, 3)
             .reshape(NB, T * Bt, Fp).astype(jnp.bfloat16))

    # clamp to [1, T]: pad_packed semantics + avoids a silent all-zeros h_last
    vl = jnp.clip(valid_len.astype(jnp.int32), 1, T)
    vl_pad = jnp.ones((Bp,), jnp.int32).at[:B].set(vl).reshape(NB, Bt, 1)

    # advisory cost estimate so XLA schedules the surrounding layout ops well
    flops = NB * (2 * T * Bt * Fp * G
                  + (L - 1) * 2 * T * Bt * Hh * G
                  + L * T * 2 * Bt * Hh * G
                  + 2 * Bt * Hh * Op)
    transcendentals = NB * L * T * Bt * 5 * Hh
    bytes_accessed = sum(int(a.size) * a.dtype.itemsize
                         for a in (x_pad, wih0, wihh, whh, b, vl_pad, fcw, fcb))
    bytes_accessed += Bp * Op * 4

    out_pad = pl.pallas_call(
        fused_var_len_lstm_kernel,
        out_shape=jax.ShapeDtypeStruct((Bp, Op), jnp.float32),
        grid_spec=pltpu.PrefetchScalarGridSpec(
            num_scalar_prefetch=0,
            grid=(NB, L),                                 # layer axis innermost
            in_specs=[
                pl.BlockSpec((None, T * Bt, Fp), lambda nb, l: (nb, 0, 0)),  # x0
                pl.BlockSpec((Fp, G), lambda nb, l: (0, 0)),                 # W_ih layer 0
                pl.BlockSpec((None, Hh, G), lambda nb, l: (l, 0, 0)),        # W_ih l>=1 (streamed)
                pl.BlockSpec((None, Hh, G), lambda nb, l: (l, 0, 0)),        # W_hh (streamed)
                pl.BlockSpec((None, 1, G), lambda nb, l: (l, 0, 0)),         # bias (streamed)
                pl.BlockSpec((None, Bt, 1), lambda nb, l: (nb, 0, 0)),       # valid_len
                pl.BlockSpec((Hh, Op), lambda nb, l: (0, 0)),                # fc weight
                pl.BlockSpec((1, Op), lambda nb, l: (0, 0)),                 # fc bias
            ],
            out_specs=pl.BlockSpec((Bt, Op), lambda nb, l: (nb, 0)),
            scratch_shapes=[
                pltpu.VMEM((T * Bt, G), jnp.float32),     # xproj (hoisted projection)
                pltpu.VMEM((T * Bt, Hh), jnp.float32),    # inter-layer hidden sequence
            ]),
        compiler_params=pltpu.CompilerParams(
            dimension_semantics=("parallel", "arbitrary"),
            vmem_limit_bytes=32 * 1024 * 1024),
        cost_estimate=pl.CostEstimate(flops=flops,
                                      transcendentals=transcendentals,
                                      bytes_accessed=bytes_accessed),
    )(x_pad, wih0, wihh, whh, b, vl_pad, fcw, fcb)

    return out_pad[:B, :out_dim]


# -------------------------- pure-JAX reference check --------------------------

def reference_forward(x, valid_len, lstm_params, fc_w, fc_b):
    B = x.shape[0]
    seq = x
    for (w_ih, w_hh, b_ih, b_hh) in lstm_params:
        H = w_hh.shape[1]

        def step(carry, x_t, w_ih=w_ih, w_hh=w_hh, b_ih=b_ih, b_hh=b_hh):
            h, c = carry
            gates = x_t @ w_ih.T + h @ w_hh.T + b_ih + b_hh
            i, f, g, o = jnp.split(gates, 4, axis=-1)
            i, f, g, o = jax.nn.sigmoid(i), jax.nn.sigmoid(f), jnp.tanh(g), jax.nn.sigmoid(o)
            c = f * c + i * g
            h = o * jnp.tanh(c)
            return (h, c), h

        init = (jnp.zeros((B, H), jnp.float32), jnp.zeros((B, H), jnp.float32))
        _, hs = jax.lax.scan(step, init, jnp.swapaxes(seq, 0, 1))
        seq = jnp.swapaxes(hs, 0, 1)
    h_last = seq[jnp.arange(B), valid_len - 1, :]
    return h_last @ fc_w.T + fc_b


# ----------------------------------- main --------------------------------------

if __name__ == "__main__":
    # Model hyperparameters implied by the module
    input_size, output_size, hidden_dim, n_layers = 4, 3, 32, 2
    B, T = 2, 8

    key = jax.random.PRNGKey(0)
    keys = jax.random.split(key, 2 + 4 * n_layers + 2)

    # deterministic PyTorch-style LSTM init: U(-1/sqrt(H), 1/sqrt(H))
    k = 1.0 / jnp.sqrt(hidden_dim)
    lstm_params = []
    ki = 0
    for layer in range(n_layers):
        in_dim = input_size if layer == 0 else hidden_dim
        w_ih = jax.random.uniform(keys[ki + 0], (4 * hidden_dim, in_dim), jnp.float32, -k, k)
        w_hh = jax.random.uniform(keys[ki + 1], (4 * hidden_dim, hidden_dim), jnp.float32, -k, k)
        b_ih = jax.random.uniform(keys[ki + 2], (4 * hidden_dim,), jnp.float32, -k, k)
        b_hh = jax.random.uniform(keys[ki + 3], (4 * hidden_dim,), jnp.float32, -k, k)
        lstm_params.append((w_ih, w_hh, b_ih, b_hh))
        ki += 4
    lstm_params = tuple(lstm_params)

    fc_w = jax.random.uniform(keys[ki + 0], (output_size, hidden_dim), jnp.float32, -k, k)
    fc_b = jax.random.uniform(keys[ki + 1], (output_size,), jnp.float32, -k, k)

    # deterministic inputs (valid_len must be >= 1)
    x = jax.random.normal(keys[-1], (B, T, input_size), jnp.float32)
    valid_len = jnp.array([8, 5], dtype=jnp.int32)

    packed = pack_variable_len_rnn_params(lstm_params, fc_w, fc_b)   # one-time packing

    out = variable_len_rnn_forward(x, valid_len, packed, out_dim=output_size)
    out = jax.block_until_ready(out)

    ref = reference_forward(x, valid_len, lstm_params, fc_w, fc_b)
    assert out.shape == (B, output_size)
    # bf16 MXU operands (f32 accumulation / f32 gate math) vs. pure-f32 reference
    assert jnp.allclose(out, ref, atol=2e-2, rtol=2e-2), (out, ref)

    print("KERNEL_OK")
</pallas_src>

<mosaic_0001>
module attributes {stable_mosaic.version = 11 : i64} {
  func.func @fused_var_len_lstm_kernel(%arg0: i32, %arg1: i32, %arg2: memref<1x64x128xbf16, #tpu.memory_space<vmem>>, %arg3: memref<128x128xbf16, #tpu.memory_space<vmem>>, %arg4: memref<1x32x128xbf16, #tpu.memory_space<vmem>>, %arg5: memref<1x32x128xbf16, #tpu.memory_space<vmem>>, %arg6: memref<1x1x128xf32, #tpu.memory_space<vmem>>, %arg7: memref<1x8x1xi32, #tpu.memory_space<vmem>>, %arg8: memref<32x128xbf16, #tpu.memory_space<vmem>>, %arg9: memref<1x128xf32, #tpu.memory_space<vmem>>, %arg10: memref<8x128xf32, #tpu.memory_space<vmem>>, %arg11: memref<64x128xf32, #tpu.memory_space<vmem>>, %arg12: memref<64x32xf32, #tpu.memory_space<vmem>>) attributes {dimension_semantics = [#tpu.dimension_semantics<parallel>, #tpu.dimension_semantics<arbitrary>], iteration_bounds = array<i64: 1, 2>, scalar_prefetch = 0 : i64, scratch_operands = 2 : i64, tpu.core_type = #tpu.core_type<tc>, window_params = [{transform_indices = @transform_0, window_bounds = array<i64: 1, 64, 128>}, {pipeline_mode = #tpu.pipeline_mode<synchronous>, transform_indices = @transform_1, window_bounds = array<i64: 128, 128>}, {transform_indices = @transform_2, window_bounds = array<i64: 1, 32, 128>}, {transform_indices = @transform_3, window_bounds = array<i64: 1, 32, 128>}, {transform_indices = @transform_4, window_bounds = array<i64: 1, 1, 128>}, {transform_indices = @transform_5, window_bounds = array<i64: 1, 8, 1>}, {pipeline_mode = #tpu.pipeline_mode<synchronous>, transform_indices = @transform_6, window_bounds = array<i64: 32, 128>}, {pipeline_mode = #tpu.pipeline_mode<synchronous>, transform_indices = @transform_7, window_bounds = array<i64: 1, 128>}, {transform_indices = @transform_8, window_bounds = array<i64: 8, 128>}]} {
    %c0 = arith.constant 0 : index
    %c0_0 = arith.constant 0 : index
    %c0_1 = arith.constant 0 : index
    %0 = vector.load %arg6[%c0, %c0_0, %c0_1] : memref<1x1x128xf32, #tpu.memory_space<vmem>>, vector<1x1x128xf32>
    %1 = vector.shape_cast %0 : vector<1x1x128xf32> to vector<1x128xf32>
    %c0_i32 = arith.constant 0 : i32
    %2 = arith.cmpi eq, %arg1, %c0_i32 : i32
    %3 = arith.extui %2 : i1 to i32
    %c0_i32_2 = arith.constant 0 : i32
    %4 = arith.cmpi ne, %3, %c0_i32_2 : i32
    scf.if %4 {
      %c0_122 = arith.constant 0 : index
      %c0_123 = arith.constant 0 : index
      %c0_124 = arith.constant 0 : index
      %348 = vector.load %arg2[%c0_122, %c0_123, %c0_124] : memref<1x64x128xbf16, #tpu.memory_space<vmem>>, vector<1x64x128xbf16>
      %349 = vector.shape_cast %348 : vector<1x64x128xbf16> to vector<64x128xbf16>
      %c0_125 = arith.constant 0 : index
      %c0_126 = arith.constant 0 : index
      %350 = vector.load %arg3[%c0_125, %c0_126] : memref<128x128xbf16, #tpu.memory_space<vmem>>, vector<128x128xbf16>
      %cst_127 = arith.constant dense<0.000000e+00> : vector<64x128xf32>
      %351 = tpu.matmul %349, %350, %cst_127 {dimension_numbers = #tpu.dot_dimension_numbers<[1], [0], [0], [1], [0, 0, 1, 1], [], []>} : vector<64x128xbf16>, vector<128x128xbf16>, vector<64x128xf32> -> vector<64x128xf32>
      %352 = vector.broadcast %1 : vector<1x128xf32> to vector<64x128xf32>
      %353 = arith.addf %352, %351 : vector<64x128xf32>
      %c0_128 = arith.constant 0 : index
      %c0_129 = arith.constant 0 : index
      %354 = vector.load %arg11[%c0_128, %c0_129] : memref<64x128xf32, #tpu.memory_space<vmem>>, vector<64x128xf32>
      tpu.vector_store %arg11[%c0_128, %c0_129], %353 {strides = array<i32>} : memref<64x128xf32, #tpu.memory_space<vmem>>, vector<64x128xf32>,
    } else {
    }
    %c0_i32_3 = arith.constant 0 : i32
    %5 = arith.cmpi sgt, %arg1, %c0_i32_3 : i32
    %6 = arith.extui %5 : i1 to i32
    %c0_i32_4 = arith.constant 0 : i32
    %7 = arith.cmpi ne, %6, %c0_i32_4 : i32
    scf.if %7 {
      %c0_122 = arith.constant 0 : index
      %c0_123 = arith.constant 0 : index
      %348 = vector.load %arg12[%c0_122, %c0_123] : memref<64x32xf32, #tpu.memory_space<vmem>>, vector<64x32xf32>
      %349 = arith.truncf %348 : vector<64x32xf32> to vector<64x32xbf16>
      %c0_124 = arith.constant 0 : index
      %c0_125 = arith.constant 0 : index
      %c0_126 = arith.constant 0 : index
      %350 = vector.load %arg4[%c0_124, %c0_125, %c0_126] : memref<1x32x128xbf16, #tpu.memory_space<vmem>>, vector<1x32x128xbf16>
      %351 = vector.shape_cast %350 : vector<1x32x128xbf16> to vector<32x128xbf16>
      %cst_127 = arith.constant dense<0.000000e+00> : vector<64x128xf32>
      %352 = tpu.matmul %349, %351, %cst_127 {dimension_numbers = #tpu.dot_dimension_numbers<[1], [0], [0], [1], [0, 0, 1, 1], [], []>} : vector<64x32xbf16>, vector<32x128xbf16>, vector<64x128xf32> -> vector<64x128xf32>
      %353 = vector.broadcast %1 : vector<1x128xf32> to vector<64x128xf32>
      %354 = arith.addf %353, %352 : vector<64x128xf32>
      %c0_128 = arith.constant 0 : index
      %c0_129 = arith.constant 0 : index
      %355 = vector.load %arg11[%c0_128, %c0_129] : memref<64x128xf32, #tpu.memory_space<vmem>>, vector<64x128xf32>
      tpu.vector_store %arg11[%c0_128, %c0_129], %354 {strides = array<i32>} : memref<64x128xf32, #tpu.memory_space<vmem>>, vector<64x128xf32>,
    } else {
    }
    %c0_5 = arith.constant 0 : index
    %c0_6 = arith.constant 0 : index
    %c0_7 = arith.constant 0 : index
    %8 = vector.load %arg5[%c0_5, %c0_6, %c0_7] : memref<1x32x128xbf16, #tpu.memory_space<vmem>>, vector<1x32x128xbf16>
    %9 = vector.shape_cast %8 : vector<1x32x128xbf16> to vector<32x128xbf16>
    %c0_8 = arith.constant 0 : index
    %c0_9 = arith.constant 0 : index
    %c0_10 = arith.constant 0 : index
    %10 = vector.load %arg7[%c0_8, %c0_9, %c0_10] : memref<1x8x1xi32, #tpu.memory_space<vmem>>, vector<1x8x1xi32>
    %11 = vector.shape_cast %10 : vector<1x8x1xi32> to vector<8x1xi32>
    %c1_i32 = arith.constant 1 : i32
    %12 = vector.broadcast %c1_i32 : i32 to vector<8x1xi32>
    %13 = arith.subi %11, %12 : vector<8x1xi32>
    %cst = arith.constant 0.000000e+00 : f32
    %14 = vector.broadcast %cst : f32 to vector<8x32xf32>
    %cst_11 = arith.constant 0.000000e+00 : f32
    %15 = vector.broadcast %cst_11 : f32 to vector<8x32xf32>
    %cst_12 = arith.constant 0.000000e+00 : f32
    %16 = vector.broadcast %cst_12 : f32 to vector<8x32xf32>
    %c0_13 = arith.constant 0 : index
    %c0_14 = arith.constant 0 : index
    %17 = vector.load %arg11[%c0_13, %c0_14] : memref<64x128xf32, #tpu.memory_space<vmem>>, vector<8x128xf32>
    %18 = arith.truncf %14 : vector<8x32xf32> to vector<8x32xbf16>
    %cst_15 = arith.constant dense<0.000000e+00> : vector<8x128xf32>
    %19 = tpu.matmul %18, %9, %cst_15 {dimension_numbers = #tpu.dot_dimension_numbers<[1], [0], [0], [1], [0, 0, 1, 1], [], []>} : vector<8x32xbf16>, vector<32x128xbf16>, vector<8x128xf32> -> vector<8x128xf32>
    %20 = arith.addf %17, %19 : vector<8x128xf32>
    %21 = vector.extract_strided_slice %20 {offsets = [0, 0], sizes = [8, 32], strides = [1, 1]} : vector<8x128xf32> to vector<8x32xf32>
    %cst_16 = arith.constant 5.000000e-01 : f32
    %22 = vector.broadcast %cst_16 : f32 to vector<8x32xf32>
    %23 = arith.mulf %22, %21 : vector<8x32xf32>
    %24 = math.tanh %23 : vector<8x32xf32>
    %cst_17 = arith.constant 1.000000e+00 : f32
    %25 = vector.broadcast %cst_17 : f32 to vector<8x32xf32>
    %26 = arith.addf %24, %25 : vector<8x32xf32>
    %cst_18 = arith.constant 5.000000e-01 : f32
    %27 = vector.broadcast %cst_18 : f32 to vector<8x32xf32>
    %28 = arith.mulf %27, %26 : vector<8x32xf32>
    %29 = vector.extract_strided_slice %20 {offsets = [0, 32], sizes = [8, 32], strides = [1, 1]} : vector<8x128xf32> to vector<8x32xf32>
    %cst_19 = arith.constant 5.000000e-01 : f32
    %30 = vector.broadcast %cst_19 : f32 to vector<8x32xf32>
    %31 = arith.mulf %30, %29 : vector<8x32xf32>
    %32 = math.tanh %31 : vector<8x32xf32>
    %cst_20 = arith.constant 1.000000e+00 : f32
    %33 = vector.broadcast %cst_20 : f32 to vector<8x32xf32>
    %34 = arith.addf %32, %33 : vector<8x32xf32>
    %cst_21 = arith.constant 5.000000e-01 : f32
    %35 = vector.broadcast %cst_21 : f32 to vector<8x32xf32>
    %36 = arith.mulf %35, %34 : vector<8x32xf32>
    %37 = vector.extract_strided_slice %20 {offsets = [0, 64], sizes = [8, 32], strides = [1, 1]} : vector<8x128xf32> to vector<8x32xf32>
    %38 = math.tanh %37 : vector<8x32xf32>
    %39 = vector.extract_strided_slice %20 {offsets = [0, 96], sizes = [8, 32], strides = [1, 1]} : vector<8x128xf32> to vector<8x32xf32>
    %cst_22 = arith.constant 5.000000e-01 : f32
    %40 = vector.broadcast %cst_22 : f32 to vector<8x32xf32>
    %41 = arith.mulf %40, %39 : vector<8x32xf32>
    %42 = math.tanh %41 : vector<8x32xf32>
    %cst_23 = arith.constant 1.000000e+00 : f32
    %43 = vector.broadcast %cst_23 : f32 to vector<8x32xf32>
    %44 = arith.addf %42, %43 : vector<8x32xf32>
    %cst_24 = arith.constant 5.000000e-01 : f32
    %45 = vector.broadcast %cst_24 : f32 to vector<8x32xf32>
    %46 = arith.mulf %45, %44 : vector<8x32xf32>
    %47 = arith.mulf %36, %15 : vector<8x32xf32>
    %48 = arith.mulf %28, %38 : vector<8x32xf32>
    %49 = arith.addf %47, %48 : vector<8x32xf32>
    %50 = math.tanh %49 : vector<8x32xf32>
    %51 = arith.mulf %46, %50 : vector<8x32xf32>
    %c0_25 = arith.constant 0 : index
    %c0_26 = arith.constant 0 : index
    %52 = vector.load %arg12[%c0_25, %c0_26] : memref<64x32xf32, #tpu.memory_space<vmem>>, vector<8x32xf32>
    tpu.vector_store %arg12[%c0_25, %c0_26], %51 {strides = array<i32>} : memref<64x32xf32, #tpu.memory_space<vmem>>, vector<8x32xf32>,
    %c0_i32_27 = arith.constant 0 : i32
    %53 = vector.broadcast %c0_i32_27 : i32 to vector<8x1xi32>
    %54 = arith.cmpi eq, %13, %53 : vector<8x1xi32>
    %55 = vector.shape_cast %54 : vector<8x1xi1> to vector<8x1xi1>
    %56 = vector.broadcast %55 : vector<8x1xi1> to vector<8x32xi1>
    %57 = arith.select %56, %51, %16 : vector<8x32xi1>, vector<8x32xf32>
    %c8 = arith.constant 8 : index
    %c0_28 = arith.constant 0 : index
    %58 = vector.load %arg11[%c8, %c0_28] : memref<64x128xf32, #tpu.memory_space<vmem>>, vector<8x128xf32>
    %59 = arith.truncf %51 : vector<8x32xf32> to vector<8x32xbf16>
    %cst_29 = arith.constant dense<0.000000e+00> : vector<8x128xf32>
    %60 = tpu.matmul %59, %9, %cst_29 {dimension_numbers = #tpu.dot_dimension_numbers<[1], [0], [0], [1], [0, 0, 1, 1], [], []>} : vector<8x32xbf16>, vector<32x128xbf16>, vector<8x128xf32> -> vector<8x128xf32>
    %61 = arith.addf %58, %60 : vector<8x128xf32>
    %62 = vector.extract_strided_slice %61 {offsets = [0, 0], sizes = [8, 32], strides = [1, 1]} : vector<8x128xf32> to vector<8x32xf32>
    %cst_30 = arith.constant 5.000000e-01 : f32
    %63 = vector.broadcast %cst_30 : f32 to vector<8x32xf32>
    %64 = arith.mulf %63, %62 : vector<8x32xf32>
    %65 = math.tanh %64 : vector<8x32xf32>
    %cst_31 = arith.constant 1.000000e+00 : f32
    %66 = vector.broadcast %cst_31 : f32 to vector<8x32xf32>
    %67 = arith.addf %65, %66 : vector<8x32xf32>
    %cst_32 = arith.constant 5.000000e-01 : f32
    %68 = vector.broadcast %cst_32 : f32 to vector<8x32xf32>
    %69 = arith.mulf %68, %67 : vector<8x32xf32>
    %70 = vector.extract_strided_slice %61 {offsets = [0, 32], sizes = [8, 32], strides = [1, 1]} : vector<8x128xf32> to vector<8x32xf32>
    %cst_33 = arith.constant 5.000000e-01 : f32
    %71 = vector.broadcast %cst_33 : f32 to vector<8x32xf32>
    %72 = arith.mulf %71, %70 : vector<8x32xf32>
    %73 = math.tanh %72 : vector<8x32xf32>
    %cst_34 = arith.constant 1.000000e+00 : f32
    %74 = vector.broadcast %cst_34 : f32 to vector<8x32xf32>
    %75 = arith.addf %73, %74 : vector<8x32xf32>
    %cst_35 = arith.constant 5.000000e-01 : f32
    %76 = vector.broadcast %cst_35 : f32 to vector<8x32xf32>
    %77 = arith.mulf %76, %75 : vector<8x32xf32>
    %78 = vector.extract_strided_slice %61 {offsets = [0, 64], sizes = [8, 32], strides = [1, 1]} : vector<8x128xf32> to vector<8x32xf32>
    %79 = math.tanh %78 : vector<8x32xf32>
    %80 = vector.extract_strided_slice %61 {offsets = [0, 96], sizes = [8, 32], strides = [1, 1]} : vector<8x128xf32> to vector<8x32xf32>
    %cst_36 = arith.constant 5.000000e-01 : f32
    %81 = vector.broadcast %cst_36 : f32 to vector<8x32xf32>
    %82 = arith.mulf %81, %80 : vector<8x32xf32>
    %83 = math.tanh %82 : vector<8x32xf32>
    %cst_37 = arith.constant 1.000000e+00 : f32
    %84 = vector.broadcast %cst_37 : f32 to vector<8x32xf32>
    %85 = arith.addf %83, %84 : vector<8x32xf32>
    %cst_38 = arith.constant 5.000000e-01 : f32
    %86 = vector.broadcast %cst_38 : f32 to vector<8x32xf32>
    %87 = arith.mulf %86, %85 : vector<8x32xf32>
    %88 = arith.mulf %77, %49 : vector<8x32xf32>
    %89 = arith.mulf %69, %79 : vector<8x32xf32>
    %90 = arith.addf %88, %89 : vector<8x32xf32>
    %91 = math.tanh %90 : vector<8x32xf32>
    %92 = arith.mulf %87, %91 : vector<8x32xf32>
    %c8_39 = arith.constant 8 : index
    %c0_40 = arith.constant 0 : index
    %93 = vector.load %arg12[%c8_39, %c0_40] : memref<64x32xf32, #tpu.memory_space<vmem>>, vector<8x32xf32>
    tpu.vector_store %arg12[%c8_39, %c0_40], %92 {strides = array<i32>} : memref<64x32xf32, #tpu.memory_space<vmem>>, vector<8x32xf32>,
    %c1_i32_41 = arith.constant 1 : i32
    %94 = vector.broadcast %c1_i32_41 : i32 to vector<8x1xi32>
    %95 = arith.cmpi eq, %13, %94 : vector<8x1xi32>
    %96 = vector.shape_cast %95 : vector<8x1xi1> to vector<8x1xi1>
    %97 = vector.broadcast %96 : vector<8x1xi1> to vector<8x32xi1>
    %98 = arith.select %97, %92, %57 : vector<8x32xi1>, vector<8x32xf32>
    %c16 = arith.constant 16 : index
    %c0_42 = arith.constant 0 : index
    %99 = vector.load %arg11[%c16, %c0_42] : memref<64x128xf32, #tpu.memory_space<vmem>>, vector<8x128xf32>
    %100 = arith.truncf %92 : vector<8x32xf32> to vector<8x32xbf16>
    %cst_43 = arith.constant dense<0.000000e+00> : vector<8x128xf32>
    %101 = tpu.matmul %100, %9, %cst_43 {dimension_numbers = #tpu.dot_dimension_numbers<[1], [0], [0], [1], [0, 0, 1, 1], [], []>} : vector<8x32xbf16>, vector<32x128xbf16>, vector<8x128xf32> -> vector<8x128xf32>
    %102 = arith.addf %99, %101 : vector<8x128xf32>
    %103 = vector.extract_strided_slice %102 {offsets = [0, 0], sizes = [8, 32], strides = [1, 1]} : vector<8x128xf32> to vector<8x32xf32>
    %cst_44 = arith.constant 5.000000e-01 : f32
    %104 = vector.broadcast %cst_44 : f32 to vector<8x32xf32>
    %105 = arith.mulf %104, %103 : vector<8x32xf32>
    %106 = math.tanh %105 : vector<8x32xf32>
    %cst_45 = arith.constant 1.000000e+00 : f32
    %107 = vector.broadcast %cst_45 : f32 to vector<8x32xf32>
    %108 = arith.addf %106, %107 : vector<8x32xf32>
    %cst_46 = arith.constant 5.000000e-01 : f32
    %109 = vector.broadcast %cst_46 : f32 to vector<8x32xf32>
    %110 = arith.mulf %109, %108 : vector<8x32xf32>
    %111 = vector.extract_strided_slice %102 {offsets = [0, 32], sizes = [8, 32], strides = [1, 1]} : vector<8x128xf32> to vector<8x32xf32>
    %cst_47 = arith.constant 5.000000e-01 : f32
    %112 = vector.broadcast %cst_47 : f32 to vector<8x32xf32>
    %113 = arith.mulf %112, %111 : vector<8x32xf32>
    %114 = math.tanh %113 : vector<8x32xf32>
    %cst_48 = arith.constant 1.000000e+00 : f32
    %115 = vector.broadcast %cst_48 : f32 to vector<8x32xf32>
    %116 = arith.addf %114, %115 : vector<8x32xf32>
    %cst_49 = arith.constant 5.000000e-01 : f32
    %117 = vector.broadcast %cst_49 : f32 to vector<8x32xf32>
    %118 = arith.mulf %117, %116 : vector<8x32xf32>
    %119 = vector.extract_strided_slice %102 {offsets = [0, 64], sizes = [8, 32], strides = [1, 1]} : vector<8x128xf32> to vector<8x32xf32>
    %120 = math.tanh %119 : vector<8x32xf32>
    %121 = vector.extract_strided_slice %102 {offsets = [0, 96], sizes = [8, 32], strides = [1, 1]} : vector<8x128xf32> to vector<8x32xf32>
    %cst_50 = arith.constant 5.000000e-01 : f32
    %122 = vector.broadcast %cst_50 : f32 to vector<8x32xf32>
    %123 = arith.mulf %122, %121 : vector<8x32xf32>
    %124 = math.tanh %123 : vector<8x32xf32>
    %cst_51 = arith.constant 1.000000e+00 : f32
    %125 = vector.broadcast %cst_51 : f32 to vector<8x32xf32>
    %126 = arith.addf %124, %125 : vector<8x32xf32>
    %cst_52 = arith.constant 5.000000e-01 : f32
    %127 = vector.broadcast %cst_52 : f32 to vector<8x32xf32>
    %128 = arith.mulf %127, %126 : vector<8x32xf32>
    %129 = arith.mulf %118, %90 : vector<8x32xf32>
    %130 = arith.mulf %110, %120 : vector<8x32xf32>
    %131 = arith.addf %129, %130 : vector<8x32xf32>
    %132 = math.tanh %131 : vector<8x32xf32>
    %133 = arith.mulf %128, %132 : vector<8x32xf32>
    %c16_53 = arith.constant 16 : index
    %c0_54 = arith.constant 0 : index
    %134 = vector.load %arg12[%c16_53, %c0_54] : memref<64x32xf32, #tpu.memory_space<vmem>>, vector<8x32xf32>
    tpu.vector_store %arg12[%c16_53, %c0_54], %133 {strides = array<i32>} : memref<64x32xf32, #tpu.memory_space<vmem>>, vector<8x32xf32>,
    %c2_i32 = arith.constant 2 : i32
    %135 = vector.broadcast %c2_i32 : i32 to vector<8x1xi32>
    %136 = arith.cmpi eq, %13, %135 : vector<8x1xi32>
    %137 = vector.shape_cast %136 : vector<8x1xi1> to vector<8x1xi1>
    %138 = vector.broadcast %137 : vector<8x1xi1> to vector<8x32xi1>
    %139 = arith.select %138, %133, %98 : vector<8x32xi1>, vector<8x32xf32>
    %c24 = arith.constant 24 : index
    %c0_55 = arith.constant 0 : index
    %140 = vector.load %arg11[%c24, %c0_55] : memref<64x128xf32, #tpu.memory_space<vmem>>, vector<8x128xf32>
    %141 = arith.truncf %133 : vector<8x32xf32> to vector<8x32xbf16>
    %cst_56 = arith.constant dense<0.000000e+00> : vector<8x128xf32>
    %142 = tpu.matmul %141, %9, %cst_56 {dimension_numbers = #tpu.dot_dimension_numbers<[1], [0], [0], [1], [0, 0, 1, 1], [], []>} : vector<8x32xbf16>, vector<32x128xbf16>, vector<8x128xf32> -> vector<8x128xf32>
    %143 = arith.addf %140, %142 : vector<8x128xf32>
    %144 = vector.extract_strided_slice %143 {offsets = [0, 0], sizes = [8, 32], strides = [1, 1]} : vector<8x128xf32> to vector<8x32xf32>
    %cst_57 = arith.constant 5.000000e-01 : f32
    %145 = vector.broadcast %cst_57 : f32 to vector<8x32xf32>
    %146 = arith.mulf %145, %144 : vector<8x32xf32>
    %147 = math.tanh %146 : vector<8x32xf32>
    %cst_58 = arith.constant 1.000000e+00 : f32
    %148 = vector.broadcast %cst_58 : f32 to vector<8x32xf32>
    %149 = arith.addf %147, %148 : vector<8x32xf32>
    %cst_59 = arith.constant 5.000000e-01 : f32
    %150 = vector.broadcast %cst_59 : f32 to vector<8x32xf32>
    %151 = arith.mulf %150, %149 : vector<8x32xf32>
    %152 = vector.extract_strided_slice %143 {offsets = [0, 32], sizes = [8, 32], strides = [1, 1]} : vector<8x128xf32> to vector<8x32xf32>
    %cst_60 = arith.constant 5.000000e-01 : f32
    %153 = vector.broadcast %cst_60 : f32 to vector<8x32xf32>
    %154 = arith.mulf %153, %152 : vector<8x32xf32>
    %155 = math.tanh %154 : vector<8x32xf32>
    %cst_61 = arith.constant 1.000000e+00 : f32
    %156 = vector.broadcast %cst_61 : f32 to vector<8x32xf32>
    %157 = arith.addf %155, %156 : vector<8x32xf32>
    %cst_62 = arith.constant 5.000000e-01 : f32
    %158 = vector.broadcast %cst_62 : f32 to vector<8x32xf32>
    %159 = arith.mulf %158, %157 : vector<8x32xf32>
    %160 = vector.extract_strided_slice %143 {offsets = [0, 64], sizes = [8, 32], strides = [1, 1]} : vector<8x128xf32> to vector<8x32xf32>
    %161 = math.tanh %160 : vector<8x32xf32>
    %162 = vector.extract_strided_slice %143 {offsets = [0, 96], sizes = [8, 32], strides = [1, 1]} : vector<8x128xf32> to vector<8x32xf32>
    %cst_63 = arith.constant 5.000000e-01 : f32
    %163 = vector.broadcast %cst_63 : f32 to vector<8x32xf32>
    %164 = arith.mulf %163, %162 : vector<8x32xf32>
    %165 = math.tanh %164 : vector<8x32xf32>
    %cst_64 = arith.constant 1.000000e+00 : f32
    %166 = vector.broadcast %cst_64 : f32 to vector<8x32xf32>
    %167 = arith.addf %165, %166 : vector<8x32xf32>
    %cst_65 = arith.constant 5.000000e-01 : f32
    %168 = vector.broadcast %cst_65 : f32 to vector<8x32xf32>
    %169 = arith.mulf %168, %167 : vector<8x32xf32>
    %170 = arith.mulf %159, %131 : vector<8x32xf32>
    %171 = arith.mulf %151, %161 : vector<8x32xf32>
    %172 = arith.addf %170, %171 : vector<8x32xf32>
    %173 = math.tanh %172 : vector<8x32xf32>
    %174 = arith.mulf %169, %173 : vector<8x32xf32>
    %c24_66 = arith.constant 24 : index
    %c0_67 = arith.constant 0 : index
    %175 = vector.load %arg12[%c24_66, %c0_67] : memref<64x32xf32, #tpu.memory_space<vmem>>, vector<8x32xf32>
    tpu.vector_store %arg12[%c24_66, %c0_67], %174 {strides = array<i32>} : memref<64x32xf32, #tpu.memory_space<vmem>>, vector<8x32xf32>,
    %c3_i32 = arith.constant 3 : i32
    %176 = vector.broadcast %c3_i32 : i32 to vector<8x1xi32>
    %177 = arith.cmpi eq, %13, %176 : vector<8x1xi32>
    %178 = vector.shape_cast %177 : vector<8x1xi1> to vector<8x1xi1>
    %179 = vector.broadcast %178 : vector<8x1xi1> to vector<8x32xi1>
    %180 = arith.select %179, %174, %139 : vector<8x32xi1>, vector<8x32xf32>
    %c32 = arith.constant 32 : index
    %c0_68 = arith.constant 0 : index
    %181 = vector.load %arg11[%c32, %c0_68] : memref<64x128xf32, #tpu.memory_space<vmem>>, vector<8x128xf32>
    %182 = arith.truncf %174 : vector<8x32xf32> to vector<8x32xbf16>
    %cst_69 = arith.constant dense<0.000000e+00> : vector<8x128xf32>
    %183 = tpu.matmul %182, %9, %cst_69 {dimension_numbers = #tpu.dot_dimension_numbers<[1], [0], [0], [1], [0, 0, 1, 1], [], []>} : vector<8x32xbf16>, vector<32x128xbf16>, vector<8x128xf32> -> vector<8x128xf32>
    %184 = arith.addf %181, %183 : vector<8x128xf32>
    %185 = vector.extract_strided_slice %184 {offsets = [0, 0], sizes = [8, 32], strides = [1, 1]} : vector<8x128xf32> to vector<8x32xf32>
    %cst_70 = arith.constant 5.000000e-01 : f32
    %186 = vector.broadcast %cst_70 : f32 to vector<8x32xf32>
    %187 = arith.mulf %186, %185 : vector<8x32xf32>
    %188 = math.tanh %187 : vector<8x32xf32>
    %cst_71 = arith.constant 1.000000e+00 : f32
    %189 = vector.broadcast %cst_71 : f32 to vector<8x32xf32>
    %190 = arith.addf %188, %189 : vector<8x32xf32>
    %cst_72 = arith.constant 5.000000e-01 : f32
    %191 = vector.broadcast %cst_72 : f32 to vector<8x32xf32>
    %192 = arith.mulf %191, %190 : vector<8x32xf32>
    %193 = vector.extract_strided_slice %184 {offsets = [0, 32], sizes = [8, 32], strides = [1, 1]} : vector<8x128xf32> to vector<8x32xf32>
    %cst_73 = arith.constant 5.000000e-01 : f32
    %194 = vector.broadcast %cst_73 : f32 to vector<8x32xf32>
    %195 = arith.mulf %194, %193 : vector<8x32xf32>
    %196 = math.tanh %195 : vector<8x32xf32>
    %cst_74 = arith.constant 1.000000e+00 : f32
    %197 = vector.broadcast %cst_74 : f32 to vector<8x32xf32>
    %198 = arith.addf %196, %197 : vector<8x32xf32>
    %cst_75 = arith.constant 5.000000e-01 : f32
    %199 = vector.broadcast %cst_75 : f32 to vector<8x32xf32>
    %200 = arith.mulf %199, %198 : vector<8x32xf32>
    %201 = vector.extract_strided_slice %184 {offsets = [0, 64], sizes = [8, 32], strides = [1, 1]} : vector<8x128xf32> to vector<8x32xf32>
    %202 = math.tanh %201 : vector<8x32xf32>
    %203 = vector.extract_strided_slice %184 {offsets = [0, 96], sizes = [8, 32], strides = [1, 1]} : vector<8x128xf32> to vector<8x32xf32>
    %cst_76 = arith.constant 5.000000e-01 : f32
    %204 = vector.broadcast %cst_76 : f32 to vector<8x32xf32>
    %205 = arith.mulf %204, %203 : vector<8x32xf32>
    %206 = math.tanh %205 : vector<8x32xf32>
    %cst_77 = arith.constant 1.000000e+00 : f32
    %207 = vector.broadcast %cst_77 : f32 to vector<8x32xf32>
    %208 = arith.addf %206, %207 : vector<8x32xf32>
    %cst_78 = arith.constant 5.000000e-01 : f32
    %209 = vector.broadcast %cst_78 : f32 to vector<8x32xf32>
    %210 = arith.mulf %209, %208 : vector<8x32xf32>
    %211 = arith.mulf %200, %172 : vector<8x32xf32>
    %212 = arith.mulf %192, %202 : vector<8x32xf32>
    %213 = arith.addf %211, %212 : vector<8x32xf32>
    %214 = math.tanh %213 : vector<8x32xf32>
    %215 = arith.mulf %210, %214 : vector<8x32xf32>
    %c32_79 = arith.constant 32 : index
    %c0_80 = arith.constant 0 : index
    %216 = vector.load %arg12[%c32_79, %c0_80] : memref<64x32xf32, #tpu.memory_space<vmem>>, vector<8x32xf32>
    tpu.vector_store %arg12[%c32_79, %c0_80], %215 {strides = array<i32>} : memref<64x32xf32, #tpu.memory_space<vmem>>, vector<8x32xf32>,
    %c4_i32 = arith.constant 4 : i32
    %217 = vector.broadcast %c4_i32 : i32 to vector<8x1xi32>
    %218 = arith.cmpi eq, %13, %217 : vector<8x1xi32>
    %219 = vector.shape_cast %218 : vector<8x1xi1> to vector<8x1xi1>
    %220 = vector.broadcast %219 : vector<8x1xi1> to vector<8x32xi1>
    %221 = arith.select %220, %215, %180 : vector<8x32xi1>, vector<8x32xf32>
    %c40 = arith.constant 40 : index
    %c0_81 = arith.constant 0 : index
    %222 = vector.load %arg11[%c40, %c0_81] : memref<64x128xf32, #tpu.memory_space<vmem>>, vector<8x128xf32>
    %223 = arith.truncf %215 : vector<8x32xf32> to vector<8x32xbf16>
    %cst_82 = arith.constant dense<0.000000e+00> : vector<8x128xf32>
    %224 = tpu.matmul %223, %9, %cst_82 {dimension_numbers = #tpu.dot_dimension_numbers<[1], [0], [0], [1], [0, 0, 1, 1], [], []>} : vector<8x32xbf16>, vector<32x128xbf16>, vector<8x128xf32> -> vector<8x128xf32>
    %225 = arith.addf %222, %224 : vector<8x128xf32>
    %226 = vector.extract_strided_slice %225 {offsets = [0, 0], sizes = [8, 32], strides = [1, 1]} : vector<8x128xf32> to vector<8x32xf32>
    %cst_83 = arith.constant 5.000000e-01 : f32
    %227 = vector.broadcast %cst_83 : f32 to vector<8x32xf32>
    %228 = arith.mulf %227, %226 : vector<8x32xf32>
    %229 = math.tanh %228 : vector<8x32xf32>
    %cst_84 = arith.constant 1.000000e+00 : f32
    %230 = vector.broadcast %cst_84 : f32 to vector<8x32xf32>
    %231 = arith.addf %229, %230 : vector<8x32xf32>
    %cst_85 = arith.constant 5.000000e-01 : f32
    %232 = vector.broadcast %cst_85 : f32 to vector<8x32xf32>
    %233 = arith.mulf %232, %231 : vector<8x32xf32>
    %234 = vector.extract_strided_slice %225 {offsets = [0, 32], sizes = [8, 32], strides = [1, 1]} : vector<8x128xf32> to vector<8x32xf32>
    %cst_86 = arith.constant 5.000000e-01 : f32
    %235 = vector.broadcast %cst_86 : f32 to vector<8x32xf32>
    %236 = arith.mulf %235, %234 : vector<8x32xf32>
    %237 = math.tanh %236 : vector<8x32xf32>
    %cst_87 = arith.constant 1.000000e+00 : f32
    %238 = vector.broadcast %cst_87 : f32 to vector<8x32xf32>
    %239 = arith.addf %237, %238 : vector<8x32xf32>
    %cst_88 = arith.constant 5.000000e-01 : f32
    %240 = vector.broadcast %cst_88 : f32 to vector<8x32xf32>
    %241 = arith.mulf %240, %239 : vector<8x32xf32>
    %242 = vector.extract_strided_slice %225 {offsets = [0, 64], sizes = [8, 32], strides = [1, 1]} : vector<8x128xf32> to vector<8x32xf32>
    %243 = math.tanh %242 : vector<8x32xf32>
    %244 = vector.extract_strided_slice %225 {offsets = [0, 96], sizes = [8, 32], strides = [1, 1]} : vector<8x128xf32> to vector<8x32xf32>
    %cst_89 = arith.constant 5.000000e-01 : f32
    %245 = vector.broadcast %cst_89 : f32 to vector<8x32xf32>
    %246 = arith.mulf %245, %244 : vector<8x32xf32>
    %247 = math.tanh %246 : vector<8x32xf32>
    %cst_90 = arith.constant 1.000000e+00 : f32
    %248 = vector.broadcast %cst_90 : f32 to vector<8x32xf32>
    %249 = arith.addf %247, %248 : vector<8x32xf32>
    %cst_91 = arith.constant 5.000000e-01 : f32
    %250 = vector.broadcast %cst_91 : f32 to vector<8x32xf32>
    %251 = arith.mulf %250, %249 : vector<8x32xf32>
    %252 = arith.mulf %241, %213 : vector<8x32xf32>
    %253 = arith.mulf %233, %243 : vector<8x32xf32>
    %254 = arith.addf %252, %253 : vector<8x32xf32>
    %255 = math.tanh %254 : vector<8x32xf32>
    %256 = arith.mulf %251, %255 : vector<8x32xf32>
    %c40_92 = arith.constant 40 : index
    %c0_93 = arith.constant 0 : index
    %257 = vector.load %arg12[%c40_92, %c0_93] : memref<64x32xf32, #tpu.memory_space<vmem>>, vector<8x32xf32>
    tpu.vector_store %arg12[%c40_92, %c0_93], %256 {strides = array<i32>} : memref<64x32xf32, #tpu.memory_space<vmem>>, vector<8x32xf32>,
    %c5_i32 = arith.constant 5 : i32
    %258 = vector.broadcast %c5_i32 : i32 to vector<8x1xi32>
    %259 = arith.cmpi eq, %13, %258 : vector<8x1xi32>
    %260 = vector.shape_cast %259 : vector<8x1xi1> to vector<8x1xi1>
    %261 = vector.broadcast %260 : vector<8x1xi1> to vector<8x32xi1>
    %262 = arith.select %261, %256, %221 : vector<8x32xi1>, vector<8x32xf32>
    %c48 = arith.constant 48 : index
    %c0_94 = arith.constant 0 : index
    %263 = vector.load %arg11[%c48, %c0_94] : memref<64x128xf32, #tpu.memory_space<vmem>>, vector<8x128xf32>
    %264 = arith.truncf %256 : vector<8x32xf32> to vector<8x32xbf16>
    %cst_95 = arith.constant dense<0.000000e+00> : vector<8x128xf32>
    %265 = tpu.matmul %264, %9, %cst_95 {dimension_numbers = #tpu.dot_dimension_numbers<[1], [0], [0], [1], [0, 0, 1, 1], [], []>} : vector<8x32xbf16>, vector<32x128xbf16>, vector<8x128xf32> -> vector<8x128xf32>
    %266 = arith.addf %263, %265 : vector<8x128xf32>
    %267 = vector.extract_strided_slice %266 {offsets = [0, 0], sizes = [8, 32], strides = [1, 1]} : vector<8x128xf32> to vector<8x32xf32>
    %cst_96 = arith.constant 5.000000e-01 : f32
    %268 = vector.broadcast %cst_96 : f32 to vector<8x32xf32>
    %269 = arith.mulf %268, %267 : vector<8x32xf32>
    %270 = math.tanh %269 : vector<8x32xf32>
    %cst_97 = arith.constant 1.000000e+00 : f32
    %271 = vector.broadcast %cst_97 : f32 to vector<8x32xf32>
    %272 = arith.addf %270, %271 : vector<8x32xf32>
    %cst_98 = arith.constant 5.000000e-01 : f32
    %273 = vector.broadcast %cst_98 : f32 to vector<8x32xf32>
    %274 = arith.mulf %273, %272 : vector<8x32xf32>
    %275 = vector.extract_strided_slice %266 {offsets = [0, 32], sizes = [8, 32], strides = [1, 1]} : vector<8x128xf32> to vector<8x32xf32>
    %cst_99 = arith.constant 5.000000e-01 : f32
    %276 = vector.broadcast %cst_99 : f32 to vector<8x32xf32>
    %277 = arith.mulf %276, %275 : vector<8x32xf32>
    %278 = math.tanh %277 : vector<8x32xf32>
    %cst_100 = arith.constant 1.000000e+00 : f32
    %279 = vector.broadcast %cst_100 : f32 to vector<8x32xf32>
    %280 = arith.addf %278, %279 : vector<8x32xf32>
    %cst_101 = arith.constant 5.000000e-01 : f32
    %281 = vector.broadcast %cst_101 : f32 to vector<8x32xf32>
    %282 = arith.mulf %281, %280 : vector<8x32xf32>
    %283 = vector.extract_strided_slice %266 {offsets = [0, 64], sizes = [8, 32], strides = [1, 1]} : vector<8x128xf32> to vector<8x32xf32>
    %284 = math.tanh %283 : vector<8x32xf32>
    %285 = vector.extract_strided_slice %266 {offsets = [0, 96], sizes = [8, 32], strides = [1, 1]} : vector<8x128xf32> to vector<8x32xf32>
    %cst_102 = arith.constant 5.000000e-01 : f32
    %286 = vector.broadcast %cst_102 : f32 to vector<8x32xf32>
    %287 = arith.mulf %286, %285 : vector<8x32xf32>
    %288 = math.tanh %287 : vector<8x32xf32>
    %cst_103 = arith.constant 1.000000e+00 : f32
    %289 = vector.broadcast %cst_103 : f32 to vector<8x32xf32>
    %290 = arith.addf %288, %289 : vector<8x32xf32>
    %cst_104 = arith.constant 5.000000e-01 : f32
    %291 = vector.broadcast %cst_104 : f32 to vector<8x32xf32>
    %292 = arith.mulf %291, %290 : vector<8x32xf32>
    %293 = arith.mulf %282, %254 : vector<8x32xf32>
    %294 = arith.mulf %274, %284 : vector<8x32xf32>
    %295 = arith.addf %293, %294 : vector<8x32xf32>
    %296 = math.tanh %295 : vector<8x32xf32>
    %297 = arith.mulf %292, %296 : vector<8x32xf32>
    %c48_105 = arith.constant 48 : index
    %c0_106 = arith.constant 0 : index
    %298 = vector.load %arg12[%c48_105, %c0_106] : memref<64x32xf32, #tpu.memory_space<vmem>>, vector<8x32xf32>
    tpu.vector_store %arg12[%c48_105, %c0_106], %297 {strides = array<i32>} : memref<64x32xf32, #tpu.memory_space<vmem>>, vector<8x32xf32>,
    %c6_i32 = arith.constant 6 : i32
    %299 = vector.broadcast %c6_i32 : i32 to vector<8x1xi32>
    %300 = arith.cmpi eq, %13, %299 : vector<8x1xi32>
    %301 = vector.shape_cast %300 : vector<8x1xi1> to vector<8x1xi1>
    %302 = vector.broadcast %301 : vector<8x1xi1> to vector<8x32xi1>
    %303 = arith.select %302, %297, %262 : vector<8x32xi1>, vector<8x32xf32>
    %c56 = arith.constant 56 : index
    %c0_107 = arith.constant 0 : index
    %304 = vector.load %arg11[%c56, %c0_107] : memref<64x128xf32, #tpu.memory_space<vmem>>, vector<8x128xf32>
    %305 = arith.truncf %297 : vector<8x32xf32> to vector<8x32xbf16>
    %cst_108 = arith.constant dense<0.000000e+00> : vector<8x128xf32>
    %306 = tpu.matmul %305, %9, %cst_108 {dimension_numbers = #tpu.dot_dimension_numbers<[1], [0], [0], [1], [0, 0, 1, 1], [], []>} : vector<8x32xbf16>, vector<32x128xbf16>, vector<8x128xf32> -> vector<8x128xf32>
    %307 = arith.addf %304, %306 : vector<8x128xf32>
    %308 = vector.extract_strided_slice %307 {offsets = [0, 0], sizes = [8, 32], strides = [1, 1]} : vector<8x128xf32> to vector<8x32xf32>
    %cst_109 = arith.constant 5.000000e-01 : f32
    %309 = vector.broadcast %cst_109 : f32 to vector<8x32xf32>
    %310 = arith.mulf %309, %308 : vector<8x32xf32>
    %311 = math.tanh %310 : vector<8x32xf32>
    %cst_110 = arith.constant 1.000000e+00 : f32
    %312 = vector.broadcast %cst_110 : f32 to vector<8x32xf32>
    %313 = arith.addf %311, %312 : vector<8x32xf32>
    %cst_111 = arith.constant 5.000000e-01 : f32
    %314 = vector.broadcast %cst_111 : f32 to vector<8x32xf32>
    %315 = arith.mulf %314, %313 : vector<8x32xf32>
    %316 = vector.extract_strided_slice %307 {offsets = [0, 32], sizes = [8, 32], strides = [1, 1]} : vector<8x128xf32> to vector<8x32xf32>
    %cst_112 = arith.constant 5.000000e-01 : f32
    %317 = vector.broadcast %cst_112 : f32 to vector<8x32xf32>
    %318 = arith.mulf %317, %316 : vector<8x32xf32>
    %319 = math.tanh %318 : vector<8x32xf32>
    %cst_113 = arith.constant 1.000000e+00 : f32
    %320 = vector.broadcast %cst_113 : f32 to vector<8x32xf32>
    %321 = arith.addf %319, %320 : vector<8x32xf32>
    %cst_114 = arith.constant 5.000000e-01 : f32
    %322 = vector.broadcast %cst_114 : f32 to vector<8x32xf32>
    %323 = arith.mulf %322, %321 : vector<8x32xf32>
    %324 = vector.extract_strided_slice %307 {offsets = [0, 64], sizes = [8, 32], strides = [1, 1]} : vector<8x128xf32> to vector<8x32xf32>
    %325 = math.tanh %324 : vector<8x32xf32>
    %326 = vector.extract_strided_slice %307 {offsets = [0, 96], sizes = [8, 32], strides = [1, 1]} : vector<8x128xf32> to vector<8x32xf32>
    %cst_115 = arith.constant 5.000000e-01 : f32
    %327 = vector.broadcast %cst_115 : f32 to vector<8x32xf32>
    %328 = arith.mulf %327, %326 : vector<8x32xf32>
    %329 = math.tanh %328 : vector<8x32xf32>
    %cst_116 = arith.constant 1.000000e+00 : f32
    %330 = vector.broadcast %cst_116 : f32 to vector<8x32xf32>
    %331 = arith.addf %329, %330 : vector<8x32xf32>
    %cst_117 = arith.constant 5.000000e-01 : f32
    %332 = vector.broadcast %cst_117 : f32 to vector<8x32xf32>
    %333 = arith.mulf %332, %331 : vector<8x32xf32>
    %334 = arith.mulf %323, %295 : vector<8x32xf32>
    %335 = arith.mulf %315, %325 : vector<8x32xf32>
    %336 = arith.addf %334, %335 : vector<8x32xf32>
    %337 = math.tanh %336 : vector<8x32xf32>
    %338 = arith.mulf %333, %337 : vector<8x32xf32>
    %c56_118 = arith.constant 56 : index
    %c0_119 = arith.constant 0 : index
    %339 = vector.load %arg12[%c56_118, %c0_119] : memref<64x32xf32, #tpu.memory_space<vmem>>, vector<8x32xf32>
    tpu.vector_store %arg12[%c56_118, %c0_119], %338 {strides = array<i32>} : memref<64x32xf32, #tpu.memory_space<vmem>>, vector<8x32xf32>,
    %c7_i32 = arith.constant 7 : i32
    %340 = vector.broadcast %c7_i32 : i32 to vector<8x1xi32>
    %341 = arith.cmpi eq, %13, %340 : vector<8x1xi32>
    %342 = vector.shape_cast %341 : vector<8x1xi1> to vector<8x1xi1>
    %343 = vector.broadcast %342 : vector<8x1xi1> to vector<8x32xi1>
    %344 = arith.select %343, %338, %303 : vector<8x32xi1>, vector<8x32xf32>
    %c1_i32_120 = arith.constant 1 : i32
    %345 = arith.cmpi eq, %arg1, %c1_i32_120 : i32
    %346 = arith.extui %345 : i1 to i32
    %c0_i32_121 = arith.constant 0 : i32
    %347 = arith.cmpi ne, %346, %c0_i32_121 : i32
    scf.if %347 {
      %c0_122 = arith.constant 0 : index
      %c0_123 = arith.constant 0 : index
      %348 = vector.load %arg9[%c0_122, %c0_123] : memref<1x128xf32, #tpu.memory_space<vmem>>, vector<1x128xf32>
      %349 = arith.truncf %344 : vector<8x32xf32> to vector<8x32xbf16>
      %c0_124 = arith.constant 0 : index
      %c0_125 = arith.constant 0 : index
      %350 = vector.load %arg8[%c0_124, %c0_125] : memref<32x128xbf16, #tpu.memory_space<vmem>>, vector<32x128xbf16>
      %cst_126 = arith.constant dense<0.000000e+00> : vector<8x128xf32>
      %351 = tpu.matmul %349, %350, %cst_126 {dimension_numbers = #tpu.dot_dimension_numbers<[1], [0], [0], [1], [0, 0, 1, 1], [], []>} : vector<8x32xbf16>, vector<32x128xbf16>, vector<8x128xf32> -> vector<8x128xf32>
      %352 = vector.broadcast %348 : vector<1x128xf32> to vector<8x128xf32>
      %353 = arith.addf %352, %351 : vector<8x128xf32>
      %c0_127 = arith.constant 0 : index
      %c0_128 = arith.constant 0 : index
      %354 = vector.load %arg10[%c0_127, %c0_128] : memref<8x128xf32, #tpu.memory_space<vmem>>, vector<8x128xf32>
      tpu.vector_store %arg10[%c0_127, %c0_128], %353 {strides = array<i32>} : memref<8x128xf32, #tpu.memory_space<vmem>>, vector<8x128xf32>,
    } else {
    }
    return
  }
  func.func @transform_0(%arg0: i32, %arg1: i32) -> (i32, i32, i32) {
    %c0_i32 = arith.constant 0 : i32
    %c0_i32_0 = arith.constant 0 : i32
    %c0_i32_1 = arith.constant 0 : i32
    return %arg0, %c0_i32, %c0_i32_0 : i32, i32, i32
  }
  func.func @transform_1(%arg0: i32, %arg1: i32) -> (i32, i32) {
    %c0_i32 = arith.constant 0 : i32
    %c0_i32_0 = arith.constant 0 : i32
    %c0_i32_1 = arith.constant 0 : i32
    return %c0_i32, %c0_i32_0 : i32, i32
  }
  func.func @transform_2(%arg0: i32, %arg1: i32) -> (i32, i32, i32) {
    %c0_i32 = arith.constant 0 : i32
    %c0_i32_0 = arith.constant 0 : i32
    %c0_i32_1 = arith.constant 0 : i32
    return %arg1, %c0_i32, %c0_i32_0 : i32, i32, i32
  }
  func.func @transform_3(%arg0: i32, %arg1: i32) -> (i32, i32, i32) {
    %c0_i32 = arith.constant 0 : i32
    %c0_i32_0 = arith.constant 0 : i32
    %c0_i32_1 = arith.constant 0 : i32
    return %arg1, %c0_i32, %c0_i32_0 : i32, i32, i32
  }
  func.func @transform_4(%arg0: i32, %arg1: i32) -> (i32, i32, i32) {
    %c0_i32 = arith.constant 0 : i32
    %c0_i32_0 = arith.constant 0 : i32
    %c0_i32_1 = arith.constant 0 : i32
    return %arg1, %c0_i32, %c0_i32_0 : i32, i32, i32
  }
  func.func @transform_5(%arg0: i32, %arg1: i32) -> (i32, i32, i32) {
    %c0_i32 = arith.constant 0 : i32
    %c0_i32_0 = arith.constant 0 : i32
    %c0_i32_1 = arith.constant 0 : i32
    return %arg0, %c0_i32, %c0_i32_0 : i32, i32, i32
  }
  func.func @transform_6(%arg0: i32, %arg1: i32) -> (i32, i32) {
    %c0_i32 = arith.constant 0 : i32
    %c0_i32_0 = arith.constant 0 : i32
    %c0_i32_1 = arith.constant 0 : i32
    return %c0_i32, %c0_i32_0 : i32, i32
  }
  func.func @transform_7(%arg0: i32, %arg1: i32) -> (i32, i32) {
    %c0_i32 = arith.constant 0 : i32
    %c0_i32_0 = arith.constant 0 : i32
    %c0_i32_1 = arith.constant 0 : i32
    return %c0_i32, %c0_i32_0 : i32, i32
  }
  func.func @transform_8(%arg0: i32, %arg1: i32) -> (i32, i32) {
    %c0_i32 = arith.constant 0 : i32
    %c0_i32_0 = arith.constant 0 : i32
    return %arg0, %c0_i32 : i32, i32
  }
}

</mosaic_0001>

<bundles_post_ra>
// kernel: variable_len_rnn_forward.1
= control target key start
LH: loop header
LB: loop body
LE: loop exit
PB: predicated region body
PF: predicated region fallthrough
CT: control target
= control target key end

     0   :  { %13 = vsyncpa [#allocation5], 0  ;;  %s2565_s0 = inlined_call_operand.vmem [shape: bf16[1,64,128], index: 0, kind: input, shape index: {}]   ;;  %s2566_s1 = inlined_call_operand.vmem [shape: bf16[128,128], index: 1, kind: input, shape index: {}]   ;;  %s2567_s2 = inlined_call_operand.vmem [shape: bf16[2,32,128], index: 2, kind: input, shape index: {}]   ;;  %s2568_s3 = inlined_call_operand.hbm [shape: bf16[2,32,128], index: 3, kind: input, shape index: {}]   ;;  %s2569_s4 = inlined_call_operand.vmem [shape: f32[2,1,128], index: 4, kind: input, shape index: {}]   ;;  %s2570_s5 = inlined_call_operand.vmem [shape: s32[1,8,1], index: 5, kind: input, shape index: {}]   ;;  %s2571_s6 = inlined_call_operand.hbm [shape: bf16[32,128], index: 6, kind: input, shape index: {}]   ;;  %s2572_s7 = inlined_call_operand.vmem [shape: f32[1,128], index: 7, kind: input, shape index: {}]   ;;  %s2573_s8 = inlined_call_operand.vmem [shape: f32[8,128], index: 8, kind: output, shape index: {}]  }
   0x1   :  { %15 = vsyncpa [#allocation5 + $0x1], 0 }
   0x2   :  { %16 = vsyncpa [#allocation7], 0  ;;  %s2171_s27 = smov 0   ;;  %s2173_s28 = smov 0  }
   0x3   :  { %s2175_s29 = smov 0   ;;  %s2177_s30 = smov 0  }
   0x4   :  { %s2179_s9 = smov 0   ;;  %s2181_s10 = smov 0  }
   0x5 LB: > { %s1629_s11 = sadd.s32 4294967295, %s2112_s10   ;;  %p127_p0 = scmp.ne.s32.totalorder %s2096_s28, %s2092_s27  ;;  %s2112_s10 = sphi %s2181_s10, %s22_s10   ;;  %s2108_s9 = sphi %s2179_s9, %s2592_s9   ;;  %s2104_s30 = sphi %s2177_s30, %s2591_s30   ;;  %s2100_s29 = sphi %s2175_s29, %s2590_s29   ;;  %s2096_s28 = sphi %s2173_s28, %s2589_s28   ;;  %s2092_s27 = sphi %s2171_s27, %s2588_s27  }
   0x6   : > { %p2201_p1 = scmp.eq.s32.totalorder %s1629_s11, 0  ;;  %p1630_p2 = scmp.ge.s32.totalorder %s2112_s10, 1 }
   0x7   : > { %p258_p3 = scmp.lt.s32.totalorder %s2112_s10, 3  ;;  %s2114_s15 = smov [#allocation6]  }
   0x8   : > { %s2579_s12 = scalar_select %p2201_p1, 1, 0 }
   0x9   : > { %p2209_p4 = por %p2201_p1, %p127_p0  ;;  %p2213_p5 = pnand %p1630_p2, %p258_p3 }
   0xa   : > { %s288_s16 = sshll.u32 %s2114_s15, 4  ;;  %s31_s18 = sadd.s32 1, %s2108_s9  ;;  %s289_s16 = int_to_ptr.vmem [resolvable:$true] %s288_s16 }
   0xb   : > { %s2580_s13 = scalar_select %p2209_p4, 1, 0 }
   0xc   : > { %s2581_s14 = scalar_select %p2213_p5, 1, 0 }
   0xd   : > { %p1862_p6 = pneg %p2213_p5  ;;  %s2000_s21 = scalar_lea.hbm %s2571_s6, 256 }
   0xe   : > { %p2001_p8 = scmp.ne.s32.totalorder %s2571_s6, %s2000_s21  ;;  %p2007_p12 = scmp.lt.u32.totalorder %s2000_s21, %s2571_s6 }
   0xf   : > { %p2221_p7 = pnand %p1862_p6, %p2201_p1 }
  0x11   : > { %p2002_p9 = pneg %p2221_p7 }
  0x13   : > { %p2003_p10 = pnand %p2002_p9, %p2001_p8 }
  0x15   : > { %p2004_p11 = pneg %p2003_p10 }
  0x17   : > { %p2009_p13 = pnand %p2007_p12, %p2004_p11 }
  0x19   : > { %2012 = shalt.err (!%p2009_p13)
}
  0x1a   : > { %s2013_s26 = scalar_lea.vmem %s289_s16, 256  ;;  %p2021_p6 = scmp.lt.s32.totalorder %s289_s16, %s289_s16 }
  0x1b   : > { %p2014_p0 = scmp.ne.s32.totalorder %s289_s16, %s2013_s26  ;;  %p2022_p1 = scmp.lt.s32.totalorder %s2013_s26, %s2013_s26 }
  0x1d   : > { %p2016_p2 = pnand %p2014_p0, %p2002_p9  ;;  %p2023_p4 = por %p2022_p1, %p2021_p6 }
  0x1f   : > { %p2017_p3 = pneg %p2016_p2 }
  0x21   : > { %p2024_p5 = pnand %p2023_p4, %p2017_p3 }
  0x23   : > { %2027 = shalt.err (!%p2024_p5)
}
  0x24   : > { %s2578_s27 = smov 64   ;;  %s2116_s11 = smov 4  }
  0x25   : > { %1865 = dma.hbm_to_vmem [thread:$0]  (!%p2221_p7), %s2571_s6, 256, %s289_s16, [#allocation7], %s2578_s27, %s2578_s27, %s2116_s11  }
  0x26   : > { %p32_p1 = scmp.ge.s32.totalorder %s31_s18, 2  ;;  %s114_s20 = sadd.s32 1, %s2100_s29 }
  0x27   : > { %p121_p4 = scmp.ne.s32.totalorder %s2100_s29, %s2096_s28  ;;  %p122_p5 = scmp.eq.s32.totalorder %s2112_s10, 0 }
  0x28   : > { %s2594_s18 = smov (%p32_p1, %s31_s18), 0  ;;  %p1871_p9 = scmp.lt.s32.totalorder %s2112_s10, 2 }
  0x29   : > { %p123_p8 = por %p122_p5, %p121_p4  ;;  %s111_s21 = ssub.s32 %s2108_s9, %s2594_s18 }
  0x2a   : > { %s313_s22 = sand.u32 1, %s2100_s29   ;;  %p112_p10 = scmp.eq.s32.totalorder %s111_s21, 0 }
  0x2b   : > { %s1635_s17 = sshll.u32 %s313_s22, 4  ;;  %s1681_s23 = sshll.u32 %s2108_s9, 8 }
  0x2c   : > { %s2257_s24 = scalar_select %p112_p10, %s2100_s29, %s114_s20  }
  0x2d   : > { %s2262_s16 = scalar_lea.hbm %s2568_s3, %s1681_s23  ;;  %s317_s15 = scalar_lea.vmem [#allocation4], %s1635_s17 }
  0x2e   : > { %s324_s19 = sshll.u32 %s317_s15, 4  ;;  %p2264_p7 = pnand %p1871_p9, %p123_p8  ;;  %s2268_s19 = int_to_ptr.vmem [resolvable:$true] %s324_s19 }
  0x2f   : > { %s2270_s20 = scalar_lea.sflag [#allocation5], %s313_s22  ;;  %s2028_s21 = scalar_lea.hbm %s2262_s16, 256 }
  0x30   : > { %p2029_p11 = scmp.ne.s32.totalorder %s2262_s16, %s2028_s21  ;;  %p2030_p12 = pneg %p2264_p7 }
  0x31   : > { %s2033_s25 = scalar_lea.hbm %s2568_s3, 512  ;;  %p2034_p2 = scmp.lt.u32.totalorder %s2262_s16, %s2568_s3 }
  0x32   : > { %p2031_p13 = pnand %p2030_p12, %p2029_p11  ;;  %p2035_p3 = scmp.lt.u32.totalorder %s2033_s25, %s2028_s21 }
  0x33   : > { %p2037_p1 = scmp.lt.u32.totalorder %s2028_s21, %s2262_s16 }
  0x34   : > { %p2032_p0 = pneg %p2031_p13  ;;  %p2036_p6 = por %p2035_p3, %p2034_p2 }
  0x36   : > { %p2038_p4 = por %p2037_p1, %p2036_p6 }
  0x38   : > { %p2039_p5 = pnand %p2038_p4, %p2032_p0 }
  0x3a   : > { %2042 = shalt.err (!%p2039_p5)
}
  0x3b   : > { %s2043_s22 = scalar_lea.vmem %s2268_s19, 256  ;;  %s2117_s17 = smov [#allocation4]  }
  0x3c   : > { %p2044_p8 = scmp.ne.s32.totalorder %s2268_s19, %s2043_s22  ;;  %s2048_s23 = sshll.u32 %s2117_s17, 4  ;;  %s2049_s23 = int_to_ptr.vmem [resolvable:$false] %s2048_s23 }
  0x3d   : > { %s2050_s26 = scalar_lea.vmem %s2049_s23, 512  ;;  %p2051_p11 = scmp.lt.s32.totalorder %s2268_s19, %s2049_s23 }
  0x3e   : > { %p2046_p9 = pnand %p2044_p8, %p2030_p12  ;;  %p2052_p13 = scmp.lt.s32.totalorder %s2050_s26, %s2043_s22 }
  0x40   : > { %p2047_p10 = pneg %p2046_p9  ;;  %p2053_p2 = por %p2052_p13, %p2051_p11 }
  0x42   : > { %p2054_p3 = pnand %p2053_p2, %p2047_p10 }
  0x44   : > { %2057 = shalt.err (!%p2054_p3)
}
  0x45   : > { %s2584_s21 = smov 64   ;;  %p2585_p12 = scmp.ne.s32.totalorder %s2581_s14, 0 }
  0x46   : > { %1869 = dma.hbm_to_vmem [thread:$0]  (!%p2264_p7), %s2262_s16, 256, %s2268_s19, %s2270_s20, %s2584_s21, %s2584_s21, %s2116_s11  }
  0x47   : > { %342 = sbr.rel (%p2585_p12) target bundleno = 6445 (0x192d), region = 52  ;;  %s344_s25 = sand.u32 (!%p2585_p12), 1, %s2096_s28  }
  0x48   : > { %s2304_s15 = sshll.u32 (!%p2585_p12), %s344_s25, 4  ;;  %s345_s22 = scalar_lea.sflag (!%p2585_p12), [#allocation5], %s344_s25 }
  0x49   : > { %s348_s17 = scalar_lea.vmem (!%p2585_p12), [#allocation4], %s2304_s15  ;;  %p2586_p0 = scmp.ne.s32.totalorder (!%p2585_p12), %s2580_s13, 0 }
  0x4e   : > { %2083 = dma.done.wait (%p2586_p0), %s345_s22, 256  }
  0x4f   : > { %2085 = vsyncadd (%p2586_p0), %s345_s22, 4294967040  ;;  %p2587_p6 = scmp.ne.s32.totalorder %s2579_s12, 0 }
  0x51   : > { %2087 = dma.done.wait (%p2587_p6), [#allocation7], 256  }
  0x52   : > { %2089 = vsyncadd (%p2587_p6), [#allocation7], 4294967040  ;;  %p406_p7 = scmp.lt.s32.totalorder %s2104_s30, 1  ;;  %p1643_p1 = scmp.ne.s32.totalorder %s2104_s30, 0 }
  0x53   : > { %v1932_v1 = vld [vmem:[%s2566_s1] sm:$0xff] (!%p1643_p1)   ;;  %v1933_v2 = vld [vmem:[%s2566_s1 + $0x8] sm:$0xff] (!%p1643_p1)   ;;  %v1934_v3 = vld [vmem:[%s2566_s1 + $0x10] sm:$0xff] (!%p1643_p1)   ;;  %v590_v13 = vlaneseq (!%p1643_p1) }
  0x54   : > { %s407_s14 = scalar_select %p406_p7, %s2104_s30, 1 }
  0x55   : > { %427 = sbr.rel (%p1643_p1) target bundleno = 335 (0x14f), region = 64  ;;  %1728 = vmatprep.subr.bf16.mxu0 (!%p1643_p1), %v1932_v1  ;;  %1836 = vmatprep.subr.bf16.mxu1 (!%p1643_p1), %v1932_v1  ;;  %v1935_v4 = vld [vmem:[%s2566_s1 + $0x18] sm:$0xff] (!%p1643_p1)   ;;  %v1940_v5 = vld [vmem:[%s2565_s0] sm:$0xff] (!%p1643_p1)   ;;  %v1941_v6 = vld [vmem:[%s2565_s0 + $0x10] sm:$0xff] (!%p1643_p1)   ;;  %v591_v14 = vshrl.u32 (!%p1643_p1), %v590_v13, 7 }
  0x56   : > { %s1682_s27 = sshll.u32 %s407_s14, 4  ;;  %s413_s19 = scalar_lea.vmem %s2569_s4, %s407_s14  ;;  %1729 = vmatpush3.bf16.msra.mxu0 (!%p1643_p1), %v1932_v1  ;;  %1844 = vmatpush3.bf16.msra.mxu1 (!%p1643_p1), %v1932_v1  ;;  %v1936_v7 = vld [vmem:[%s2566_s1 + $0x20] sm:$0xff] (!%p1643_p1)   ;;  %v1937_v8 = vld [vmem:[%s2566_s1 + $0x28] sm:$0xff] (!%p1643_p1)   ;;  %v1938_v9 = vld [vmem:[%s2566_s1 + $0x30] sm:$0xff] (!%p1643_p1)  }
  0x57   : > { %s2323_s13 = scalar_lea.vmem %s2567_s2, %s1682_s27  ;;  %v2325_v0 = vld [vmem:[%s413_s19] sm:$0x1]  ;;  %1730 = vmatprep.subr.bf16.mxu0 (!%p1643_p1), %v1933_v2  ;;  %1837 = vmatprep.subr.bf16.mxu1 (!%p1643_p1), %v1933_v2  ;;  %v1939_v10 = vld [vmem:[%s2566_s1 + $0x38] sm:$0xff] (!%p1643_p1)   ;;  %v1942_v11 = vld [vmem:[%s2565_s0 + $0x8] sm:$0xff] (!%p1643_p1)   ;;  %v592_v15 = vsub.s32 (!%p1643_p1), 0, %v591_v14 }
  0x58   : > { %1744 = vmatprep.mubr.bf16.mxu0 (!%p1643_p1), %v1940_v5  ;;  %1748 = vmatprep.mubr.bf16.mxu1 (!%p1643_p1), %v1941_v6  ;;  %v1943_v12 = vld [vmem:[%s2565_s0 + $0x18] sm:$0xff] (!%p1643_p1)  }
  0x59   : > { %v593_v16 = vrot.slane (!%p1643_p1), %v2325_v0, %v592_v15 }
  0x5a   : > { %1731 = vmatpush3.bf16.msra.mxu0 (!%p1643_p1), %v1933_v2  ;;  %1845 = vmatpush3.bf16.msra.mxu1 (!%p1643_p1), %v1933_v2 }
  0x5b   : > { %1732 = vmatprep.subr.bf16.mxu0 (!%p1643_p1), %v1934_v3  ;;  %1838 = vmatprep.subr.bf16.mxu1 (!%p1643_p1), %v1934_v3 }
  0x5e   : > { %1733 = vmatpush3.bf16.msra.mxu0 %v1934_v3  ;;  %1846 = vmatpush3.bf16.msra.mxu1 %v1934_v3 }
  0x5f   : > { %1734 = vmatprep.subr.bf16.mxu0 %v1935_v4  ;;  %1839 = vmatprep.subr.bf16.mxu1 %v1935_v4 }
  0x62   : > { %1735 = vmatpush3.bf16.msra.mxu0 %v1935_v4  ;;  %1847 = vmatpush3.bf16.msra.mxu1 %v1935_v4 }
  0x63   : > { %1736 = vmatprep.subr.bf16.mxu0 %v1936_v7  ;;  %1840 = vmatprep.subr.bf16.mxu1 %v1936_v7 }
  0x66   : > { %1737 = vmatpush3.bf16.msra.mxu0 %v1936_v7  ;;  %1848 = vmatpush3.bf16.msra.mxu1 %v1936_v7 }
  0x67   : > { %1738 = vmatprep.subr.bf16.mxu0 %v1937_v8  ;;  %1841 = vmatprep.subr.bf16.mxu1 %v1937_v8 }
  0x6a   : > { %1739 = vmatpush3.bf16.msra.mxu0 %v1937_v8  ;;  %1849 = vmatpush3.bf16.msra.mxu1 %v1937_v8 }
  0x6b   : > { %1740 = vmatprep.subr.bf16.mxu0 %v1938_v9  ;;  %1842 = vmatprep.subr.bf16.mxu1 %v1938_v9 }
  0x6e   : > { %1741 = vmatpush3.bf16.msra.mxu0 %v1938_v9  ;;  %1850 = vmatpush3.bf16.msra.mxu1 %v1938_v9 }
  0x6f   : > { %1742 = vmatprep.subr.bf16.mxu0 %v1939_v10  ;;  %1843 = vmatprep.subr.bf16.mxu1 %v1939_v10 }
  0x72   : > { %1743 = vmatpush3.bf16.msra.mxu0 %v1939_v10  ;;  %1851 = vmatpush3.bf16.msra.mxu1 %v1939_v10 }
  0x75   : > { %1745 = vmatmul.mubr.bf16.vlgmr.msra.gmra.mrb[0].mxu0 %v1942_v11  ;;  %1749 = vmatmul.mubr.bf16.vlgmr.msra.gmra.mrb[0].mxu1 %v1943_v12 }
 0x148   : > { %v1746_v17 = vpop.f32.mrb[0].mxu0  ;;  %v1750_v18 = vpop.f32.mrb[0].mxu1 }
 0x149   : > { %v597_v19 = vadd.f32 %v1746_v17, %v593_v16  ;;  %v601_v20 = vadd.f32 %v1750_v18, %v593_v16  ;;  %v558_v21 = vpop.f32.mrb[1].mxu0  ;;  %v574_v22 = vpop.f32.mrb[1].mxu1 }
 0x14a   : > { %v595_v23 = vadd.f32 %v593_v16, %v558_v21  ;;  %v599_v24 = vadd.f32 %v593_v16, %v574_v22  ;;  %v1747_v25 = vpop.f32.mrb[2].mxu0  ;;  %v1751_v26 = vpop.f32.mrb[2].mxu1 }
 0x14b   : > { %605 = vst [vmem:[#allocation2 + $0x10] sm:$0xff] %v597_v19  ;;  %609 = vst [vmem:[#allocation2 + $0x30] sm:$0xff] %v601_v20  ;;  %v598_v27 = vadd.f32 %v1747_v25, %v593_v16  ;;  %v602_v28 = vadd.f32 %v1751_v26, %v593_v16  ;;  %v561_v29 = vpop.f32.mrb[3].mxu0  ;;  %v577_v30 = vpop.f32.mrb[3].mxu1 }
 0x14c   : > { %603 = vst [vmem:[#allocation2] sm:$0xff] %v595_v23  ;;  %607 = vst [vmem:[#allocation2 + $0x20] sm:$0xff] %v599_v24  ;;  %v596_v31 = vadd.f32 %v593_v16, %v561_v29  ;;  %v600_v32 = vadd.f32 %v593_v16, %v577_v30 }
 0x14d   : > { %606 = vst [vmem:[#allocation2 + $0x18] sm:$0xff] %v598_v27  ;;  %610 = vst [vmem:[#allocation2 + $0x38] sm:$0xff] %v602_v28 }
 0x14e   : > { %604 = vst [vmem:[#allocation2 + $0x8] sm:$0xff] %v596_v31  ;;  %608 = vst [vmem:[#allocation2 + $0x28] sm:$0xff] %v600_v32 }
 0x14f PF: > { %p1656_p4 = scmp.le.s32.totalorder %s2104_s30, 0 }
 0x150   : > { %v1944_v33 = vld [vmem:[%s2323_s13] sm:$0xff] (!%p1656_p4)   ;;  %v1945_v34 = vld [vmem:[%s2323_s13 + $0x8] sm:$0xff] (!%p1656_p4)   ;;  %vm643_vm0 = vcmask (!%p1656_p4), 261120   ;;  %v617_v40 = vld [vmem:[#allocation3 + $0x10] sm:$0xff] (!%p1656_p4)  ;;  %v722_v47 = vlaneseq (!%p1656_p4) }
 0x151   : > { %614 = sbr.rel (%p1656_p4) target bundleno = 563 (0x233), region = 68  ;;  %1752 = vmatprep.subr.bf16.mxu0 (!%p1656_p4), %v1944_v33  ;;  %1852 = vmatprep.subr.bf16.mxu1 (!%p1656_p4), %v1944_v33  ;;  %v615_v35 = vld [vmem:[#allocation3] sm:$0xff] (!%p1656_p4)  ;;  %v616_v36 = vld [vmem:[#allocation3 + $0x8] sm:$0xff] (!%p1656_p4)  ;;  %v618_v41 = vld [vmem:[#allocation3 + $0x18] sm:$0xff] (!%p1656_p4) }
 0x152   : > { %v619_v37 = vld [vmem:[#allocation3 + $0x20] sm:$0xff] (!%p1656_p4)  ;;  %1753 = vmatpush3.bf16.msra.mxu0 (!%p1656_p4), %v1944_v33  ;;  %1854 = vmatpush3.bf16.msra.mxu1 (!%p1656_p4), %v1944_v33  ;;  %v623_v38 = vpack.c.bf16 (!%p1656_p4), %v616_v36, %v615_v35  ;;  %v620_v39 = vld [vmem:[#allocation3 + $0x28] sm:$0xff] (!%p1656_p4)  ;;  %v621_v43 = vld [vmem:[#allocation3 + $0x30] sm:$0xff] (!%p1656_p4)  ;;  %v624_v45 = vpack.c.bf16 (!%p1656_p4), %v618_v41, %v617_v40  ;;  %v723_v48 = vshrl.u32 (!%p1656_p4), %v722_v47, 7 }
 0x153   : > { %1754 = vmatprep.subr.bf16.mxu0 (!%p1656_p4), %v1945_v34  ;;  %1853 = vmatprep.subr.bf16.mxu1 (!%p1656_p4), %v1945_v34  ;;  %v625_v42 = vpack.c.bf16 (!%p1656_p4), %v620_v39, %v619_v37  ;;  %v622_v44 = vld [vmem:[#allocation3 + $0x38] sm:$0xff] (!%p1656_p4) }
 0x154   : > { %1756 = vmatprep.mubr.msk.bf16.mxu0 (!%p1656_p4), %vm643_vm0, %v623_v38  ;;  %v626_v46 = vpack.c.bf16 (!%p1656_p4), %v622_v44, %v621_v43  ;;  %v724_v49 = vsub.s32 (!%p1656_p4), 0, %v723_v48 }
 0x155   : > { %1760 = vmatprep.mubr.msk.bf16.mxu1 (!%p1656_p4), %vm643_vm0, %v625_v42 }
 0x156   : > { %1755 = vmatpush3.bf16.msra.mxu0 (!%p1656_p4), %v1945_v34  ;;  %1855 = vmatpush3.bf16.msra.mxu1 (!%p1656_p4), %v1945_v34  ;;  %v725_v50 = vrot.slane (!%p1656_p4), %v2325_v0, %v724_v49 }
 0x159   : > { %1757 = vmatmul.mubr.msk.bf16.vlgmr.msra.gmra.mrb[0].mxu0 %vm643_vm0, %v624_v45  ;;  %1761 = vmatmul.mubr.msk.bf16.vlgmr.msra.gmra.mrb[0].mxu1 %vm643_vm0, %v626_v46 }
 0x22c   : > { %v1758_v51 = vpop.f32.mrb[0].mxu0  ;;  %v1762_v52 = vpop.f32.mrb[0].mxu1 }
 0x22d   : > { %v729_v53 = vadd.f32 %v1758_v51, %v725_v50  ;;  %v733_v54 = vadd.f32 %v1762_v52, %v725_v50  ;;  %v690_v55 = vpop.f32.mrb[1].mxu0  ;;  %v706_v56 = vpop.f32.mrb[1].mxu1 }
 0x22e   : > { %v727_v57 = vadd.f32 %v725_v50, %v690_v55  ;;  %v731_v58 = vadd.f32 %v725_v50, %v706_v56  ;;  %v1759_v59 = vpop.f32.mrb[2].mxu0  ;;  %v1763_v60 = vpop.f32.mrb[2].mxu1 }
 0x22f   : > { %737 = vst [vmem:[#allocation2 + $0x10] sm:$0xff] %v729_v53  ;;  %741 = vst [vmem:[#allocation2 + $0x30] sm:$0xff] %v733_v54  ;;  %v730_v61 = vadd.f32 %v1759_v59, %v725_v50  ;;  %v734_v62 = vadd.f32 %v1763_v60, %v725_v50  ;;  %v693_v63 = vpop.f32.mrb[3].mxu0  ;;  %v709_v1 = vpop.f32.mrb[3].mxu1 }
 0x230   : > { %735 = vst [vmem:[#allocation2] sm:$0xff] %v727_v57  ;;  %739 = vst [vmem:[#allocation2 + $0x20] sm:$0xff] %v731_v58  ;;  %v728_v2 = vadd.f32 %v725_v50, %v693_v63  ;;  %v732_v0 = vadd.f32 %v725_v50, %v709_v1 }
 0x231   : > { %738 = vst [vmem:[#allocation2 + $0x18] sm:$0xff] %v730_v61  ;;  %742 = vst [vmem:[#allocation2 + $0x38] sm:$0xff] %v734_v62 }
 0x232   : > { %736 = vst [vmem:[#allocation2 + $0x8] sm:$0xff] %v728_v2  ;;  %740 = vst [vmem:[#allocation2 + $0x28] sm:$0xff] %v732_v0 }
 0x233 PF: > { %v2375_v3 = vld [vmem:[%s348_s17] sm:$0xff]   ;;  %v2118_v4 = vmov 0.0   ;;  %v2382_v5 = vld [vmem:[%s348_s17 + $0x8] sm:$0xff]   ;;  %vm2119_vm1 = vmmov 0   ;;  %v2120_v6 = vmov 0   ;;  %s2121_s15 = smov 64  }
 0x234   : > { %1764 = vmatprep.subr.bf16.mxu0 %v2118_v4  ;;  %1772 = vmatprep.subr.bf16.mxu1 %v2118_v4  ;;  %s2122_s17 = smov 32   ;;  %vm762_vm2 = vcmask 261120   ;;  %p1673_p5 = scmp.ne.s32.totalorder %s2104_s30, 1 }
 0x235   : > { %1765 = vmatpush3.bf16.msra.mxu0 %v2375_v3  ;;  %1768 = vmatprep.mubr.msk.bf16.mxu0 %vm2119_vm1, %v2118_v4  ;;  %s2124_s26 = smov (!%p1673_p5), 32  }
 0x236   : > { %1766 = vmatprep.subr.bf16.mxu0 %v2118_v4  ;;  %1773 = vmatpush3.bf16.msra.mxu1 %v2375_v3  ;;  %v924_v49 = vld [vmem:[#allocation2 + $0x10] sm:$0xff] }
 0x237   : > { %1774 = vmatprep.subr.bf16.mxu1 %v2118_v4  ;;  %1776 = vmatprep.mubr.msk.bf16.mxu1 %vm2119_vm1, %v2118_v4  ;;  %v749_v7 = vld [vmem:[#allocation2] sm:$0xff] }
 0x238   : > { %1946 = vset.pattern.permute.xlu1 %v2120_v6  ;;  %1947 = vset.pattern.permute.xlu0 %v2120_v6 }
 0x239   : > { %1767 = vmatpush3.bf16.msra.mxu0 %v2382_v5  ;;  %v841_v28 = vld [vmem:[#allocation2 + $0x8] sm:$0xff] }
 0x23a   : > { %1775 = vmatpush3.bf16.msra.mxu1 %v2382_v5  ;;  %1780 = vmatprep.subr.bf16.mxu0 %v2118_v4 }
 0x23b   : > { %1788 = vmatprep.subr.bf16.mxu1 %v2118_v4 }
 0x23c   : > { %1769 = vmatmul.mubr.bf16.vlgmr.msra.gmra.mrb[0].mxu0 %v2120_v6 }
 0x23d   : > { %1781 = vmatpush3.bf16.msra.mxu0 %v2375_v3  ;;  %1784 = vmatprep.mubr.msk.bf16.mxu0 %vm2119_vm1, %v2118_v4 }
 0x23e   : > { %1782 = vmatprep.subr.bf16.mxu0 %v2118_v4 }
 0x241   : > { %1783 = vmatpush3.bf16.msra.mxu0 %v2382_v5 }
 0x242   : > { %1796 = vmatprep.subr.bf16.mxu0 %v2118_v4 }
 0x30f   : > { %v800_v8 = vpop.f32.mrb[0].mxu0 }
 0x310   : > { %v806_v9 = vadd.f32 %v800_v8, %v749_v7  ;;  %v1770_v10 = vpop.f32.mrb[1].mxu0 }
 0x311   : > { %v803_v11 = vpop.f32.mrb[2].mxu0  ;;  %v1007_v10 = vld [vmem:[#allocation2 + $0x18] sm:$0xff] }
 0x312   : > { %1950 = vtanh.f32 %v806_v9  ;;  %v1771_v12 = vpop.f32.mrb[3].mxu0  ;;  %v807_v14 = vmul.f32 0.5, %v806_v9 }
 0x314   : > { %1952 = vtanh.f32 %v807_v14 }
 0x31c   : > { %v1951_v13 = vpop.eup %1950 }
 0x31d   : > { %814 = vrot.lane.b32.xlu0 %v1951_v13, %s2121_s15 }
 0x31e   : > { %v1953_v15 = vpop.eup %1952 }
 0x31f   : > { %v809_v16 = vadd.f32 1.0, %v1953_v15 }
 0x321   : > { %v810_v17 = vmul.f32 0.5, %v809_v16 }
 0x323   : > { %v812_v20 = vmul.f32 0.0, %v810_v17 }
 0x38f   : > { %v815_v18 = vpop.permute.xlu0 %814 }
 0x390   : > { %v817_v19 = vmul.f32 %v815_v18, %v810_v17 }
 0x392   : > { %819 = vrot.lane.b32.xlu0 %v817_v19, %s2122_s17 }
 0x404   : > { %v820_v21 = vpop.permute.xlu0 %819 }
 0x405   : > { %v822_v22 = vadd.f32 %v820_v21, %v812_v20 }
 0x407   : > { %1954 = vtanh.f32 %v822_v22 }
 0x411   : > { %v1955_v23 = vpop.eup %1954 }
 0x412   : > { %825 = vrot.lane.b32.xlu1 %v1955_v23, %s2121_s15 }
 0x484   : > { %v826_v24 = vpop.permute.xlu1 %825 }
 0x485   : > { %v2407_v25 = vmul.f32 %v826_v24, %v810_v17 }
 0x487   : > { %v842_v26 = vpack.c.bf16 %v2407_v25, %v2407_v25 }
 0x489   : > { %844 = vrot.lane.b32.xlu1 %v842_v26, %s2122_s17 }
 0x4fb   : > { %v845_v27 = vpop.permute.xlu1 %844 }
 0x4fc   : > { %1777 = vmatmul.mubr.msk.bf16.vlgmr.msra.gmra.mrb[0].mxu1 %vm762_vm2, %v845_v27 }
 0x4fd   : > { %1789 = vmatpush3.bf16.msra.mxu1 %v2375_v3  ;;  %1792 = vmatprep.mubr.msk.bf16.mxu1 %vm2119_vm1, %v2118_v4 }
 0x4fe   : > { %1790 = vmatprep.subr.bf16.mxu1 %v2118_v4 }
 0x501   : > { %1791 = vmatpush3.bf16.msra.mxu1 %v2382_v5 }
 0x502   : > { %1804 = vmatprep.subr.bf16.mxu1 %v2118_v4 }
 0x5cf   : > { %v883_v29 = vpop.f32.mrb[0].mxu1 }
 0x5d0   : > { %v889_v30 = vadd.f32 %v883_v29, %v841_v28  ;;  %v1778_v31 = vpop.f32.mrb[1].mxu1 }
 0x5d1   : > { %v886_v32 = vpop.f32.mrb[2].mxu1 }
 0x5d2   : > { %1956 = vtanh.f32 %v889_v30  ;;  %v1779_v33 = vpop.f32.mrb[3].mxu1  ;;  %v890_v35 = vmul.f32 0.5, %v889_v30  ;;  %v1090_v32 = vld [vmem:[#allocation2 + $0x20] sm:$0xff] }
 0x5d4   : > { %1958 = vtanh.f32 %v890_v35 }
 0x5dc   : > { %v1957_v34 = vpop.eup %1956 }
 0x5dd   : > { %897 = vrot.lane.b32.xlu0 %v1957_v34, %s2121_s15 }
 0x5de   : > { %v1959_v36 = vpop.eup %1958 }
 0x5df   : > { %v892_v37 = vadd.f32 1.0, %v1959_v36 }
 0x5e1   : > { %v893_v38 = vmul.f32 0.5, %v892_v37 }
 0x5e3   : > { %v895_v41 = vmul.f32 %v893_v38, %v822_v22 }
 0x64f   : > { %v898_v39 = vpop.permute.xlu0 %897 }
 0x650   : > { %v900_v40 = vmul.f32 %v898_v39, %v893_v38 }
 0x652   : > { %902 = vrot.lane.b32.xlu1 %v900_v40, %s2122_s17 }
 0x6c4   : > { %v903_v42 = vpop.permute.xlu1 %902 }
 0x6c5   : > { %v905_v43 = vadd.f32 %v903_v42, %v895_v41 }
 0x6c7   : > { %1960 = vtanh.f32 %v905_v43 }
 0x6d1   : > { %v1961_v44 = vpop.eup %1960 }
 0x6d2   : > { %908 = vrot.lane.b32.xlu0 %v1961_v44, %s2121_s15 }
 0x744   : > { %v909_v45 = vpop.permute.xlu0 %908 }
 0x745   : > { %v2422_v46 = vmul.f32 %v909_v45, %v893_v38 }
 0x747   : > { %v925_v47 = vpack.c.bf16 %v2422_v46, %v2422_v46 }
 0x749   : > { %927 = vrot.lane.b32.xlu1 %v925_v47, %s2122_s17 }
 0x7bb   : > { %v928_v48 = vpop.permute.xlu1 %927 }
 0x7bc   : > { %1785 = vmatmul.mubr.msk.bf16.vlgmr.msra.gmra.mrb[4].mxu0 %vm762_vm2, %v928_v48 }
 0x7bd   : > { %1797 = vmatpush3.bf16.msra.mxu0 %v2375_v3  ;;  %1800 = vmatprep.mubr.msk.bf16.mxu0 %vm2119_vm1, %v2118_v4 }
 0x7be   : > { %1798 = vmatprep.subr.bf16.mxu0 %v2118_v4 }
 0x7c1   : > { %1799 = vmatpush3.bf16.msra.mxu0 %v2382_v5 }
 0x7c2   : > { %1812 = vmatprep.subr.bf16.mxu0 %v2118_v4 }
 0x88f   : > { %v966_v50 = vpop.f32.mrb[4].mxu0 }
 0x890   : > { %v972_v51 = vadd.f32 %v966_v50, %v924_v49  ;;  %v1786_v52 = vpop.f32.mrb[5].mxu0 }
 0x891   : > { %v969_v53 = vpop.f32.mrb[6].mxu0 }
 0x892   : > { %1962 = vtanh.f32 %v972_v51  ;;  %v1787_v54 = vpop.f32.mrb[7].mxu0  ;;  %v973_v56 = vmul.f32 0.5, %v972_v51 }
 0x893   : > { %v1173_v54 = vld [vmem:[#allocation2 + $0x28] sm:$0xff] }
 0x894   : > { %1964 = vtanh.f32 %v973_v56 }
 0x89c   : > { %v1963_v55 = vpop.eup %1962 }
 0x89d   : > { %980 = vrot.lane.b32.xlu0 %v1963_v55, %s2121_s15 }
 0x89e   : > { %v1965_v57 = vpop.eup %1964 }
 0x89f   : > { %v975_v58 = vadd.f32 1.0, %v1965_v57 }
 0x8a1   : > { %v976_v59 = vmul.f32 0.5, %v975_v58 }
 0x8a3   : > { %v978_v62 = vmul.f32 %v976_v59, %v905_v43 }
 0x90f   : > { %v981_v60 = vpop.permute.xlu0 %980 }
 0x910   : > { %v983_v61 = vmul.f32 %v981_v60, %v976_v59 }
 0x912   : > { %985 = vrot.lane.b32.xlu1 %v983_v61, %s2122_s17 }
 0x984   : > { %v986_v63 = vpop.permute.xlu1 %985 }
 0x985   : > { %v988_v1 = vadd.f32 %v986_v63, %v978_v62 }
 0x987   : > { %1966 = vtanh.f32 %v988_v1 }
 0x991   : > { %v1967_v2 = vpop.eup %1966 }
 0x992   : > { %991 = vrot.lane.b32.xlu0 %v1967_v2, %s2121_s15 }
 0xa04   : > { %v992_v0 = vpop.permute.xlu0 %991 }
 0xa05   : > { %v2437_v7 = vmul.f32 %v992_v0, %v976_v59 }
 0xa07   : > { %v1008_v8 = vpack.c.bf16 %v2437_v7, %v2437_v7 }
 0xa09   : > { %1010 = vrot.lane.b32.xlu1 %v1008_v8, %s2122_s17 }
 0xa7b   : > { %v1011_v9 = vpop.permute.xlu1 %1010 }
 0xa7c   : > { %1793 = vmatmul.mubr.msk.bf16.vlgmr.msra.gmra.mrb[4].mxu1 %vm762_vm2, %v1011_v9 }
 0xa7d   : > { %1805 = vmatpush3.bf16.msra.mxu1 %v2375_v3  ;;  %1808 = vmatprep.mubr.msk.bf16.mxu1 %vm2119_vm1, %v2118_v4 }
 0xa7e   : > { %1806 = vmatprep.subr.bf16.mxu1 %v2118_v4 }
 0xa81   : > { %1807 = vmatpush3.bf16.msra.mxu1 %v2382_v5 }
 0xa82   : > { %1820 = vmatprep.subr.bf16.mxu1 %v2118_v4 }
 0xb4f   : > { %v1049_v11 = vpop.f32.mrb[4].mxu1 }
 0xb50   : > { %v1055_v12 = vadd.f32 %v1049_v11, %v1007_v10  ;;  %v1794_v13 = vpop.f32.mrb[5].mxu1 }
 0xb51   : > { %v1052_v14 = vpop.f32.mrb[6].mxu1  ;;  %v1256_v13 = vld [vmem:[#allocation2 + $0x30] sm:$0xff] }
 0xb52   : > { %1968 = vtanh.f32 %v1055_v12  ;;  %v1795_v15 = vpop.f32.mrb[7].mxu1  ;;  %v1056_v17 = vmul.f32 0.5, %v1055_v12 }
 0xb54   : > { %1970 = vtanh.f32 %v1056_v17 }
 0xb5c   : > { %v1969_v16 = vpop.eup %1968 }
 0xb5d   : > { %1063 = vrot.lane.b32.xlu0 %v1969_v16, %s2121_s15 }
 0xb5e   : > { %v1971_v18 = vpop.eup %1970 }
 0xb5f   : > { %v1058_v19 = vadd.f32 1.0, %v1971_v18 }
 0xb61   : > { %v1059_v20 = vmul.f32 0.5, %v1058_v19 }
 0xb63   : > { %v1061_v23 = vmul.f32 %v1059_v20, %v988_v1 }
 0xbcf   : > { %v1064_v21 = vpop.permute.xlu0 %1063 }
 0xbd0   : > { %v1066_v22 = vmul.f32 %v1064_v21, %v1059_v20 }
 0xbd2   : > { %1068 = vrot.lane.b32.xlu1 %v1066_v22, %s2122_s17 }
 0xc44   : > { %v1069_v24 = vpop.permute.xlu1 %1068 }
 0xc45   : > { %v1071_v26 = vadd.f32 %v1069_v24, %v1061_v23 }
 0xc47   : > { %1972 = vtanh.f32 %v1071_v26 }
 0xc51   : > { %v1973_v27 = vpop.eup %1972 }
 0xc52   : > { %1074 = vrot.lane.b32.xlu0 %v1973_v27, %s2121_s15 }
 0xcc4   : > { %v1075_v28 = vpop.permute.xlu0 %1074 }
 0xcc5   : > { %v2452_v29 = vmul.f32 %v1075_v28, %v1059_v20 }
 0xcc7   : > { %v1091_v30 = vpack.c.bf16 %v2452_v29, %v2452_v29 }
 0xcc9   : > { %1093 = vrot.lane.b32.xlu1 %v1091_v30, %s2122_s17 }
 0xd3b   : > { %v1094_v31 = vpop.permute.xlu1 %1093 }
 0xd3c   : > { %1801 = vmatmul.mubr.msk.bf16.vlgmr.msra.gmra.mrb[8].mxu0 %vm762_vm2, %v1094_v31 }
 0xd3d   : > { %1813 = vmatpush3.bf16.msra.mxu0 %v2375_v3  ;;  %1816 = vmatprep.mubr.msk.bf16.mxu0 %vm2119_vm1, %v2118_v4 }
 0xd3e   : > { %1814 = vmatprep.subr.bf16.mxu0 %v2118_v4 }
 0xd41   : > { %1815 = vmatpush3.bf16.msra.mxu0 %v2382_v5 }
 0xe0f   : > { %v1132_v33 = vpop.f32.mrb[8].mxu0 }
 0xe10   : > { %v1138_v34 = vadd.f32 %v1132_v33, %v1090_v32  ;;  %v1802_v35 = vpop.f32.mrb[9].mxu0 }
 0xe11   : > { %v1135_v36 = vpop.f32.mrb[10].mxu0 }
 0xe12   : > { %1974 = vtanh.f32 %v1138_v34  ;;  %v1803_v37 = vpop.f32.mrb[11].mxu0  ;;  %v1139_v39 = vmul.f32 0.5, %v1138_v34  ;;  %v1339_v36 = vld [vmem:[#allocation2 + $0x38] sm:$0xff] }
 0xe14   : > { %1976 = vtanh.f32 %v1139_v39 }
 0xe1c   : > { %v1975_v38 = vpop.eup %1974 }
 0xe1d   : > { %1146 = vrot.lane.b32.xlu0 %v1975_v38, %s2121_s15 }
 0xe1e   : > { %v1977_v40 = vpop.eup %1976 }
 0xe1f   : > { %v1141_v41 = vadd.f32 1.0, %v1977_v40 }
 0xe21   : > { %v1142_v42 = vmul.f32 0.5, %v1141_v41 }
 0xe23   : > { %v1144_v45 = vmul.f32 %v1142_v42, %v1071_v26 }
 0xe8f   : > { %v1147_v43 = vpop.permute.xlu0 %1146 }
 0xe90   : > { %v1149_v44 = vmul.f32 %v1147_v43, %v1142_v42 }
 0xe92   : > { %1151 = vrot.lane.b32.xlu1 %v1149_v44, %s2122_s17 }
 0xf04   : > { %v1152_v47 = vpop.permute.xlu1 %1151 }
 0xf05   : > { %v1154_v48 = vadd.f32 %v1152_v47, %v1144_v45  ;;  %v747_v45 = vld [vmem:[%s2570_s5] sm:$0xff] }
 0xf07   : > { %1978 = vtanh.f32 %v1154_v48 }
 0xf11   : > { %v1979_v49 = vpop.eup %1978 }
 0xf12   : > { %1157 = vrot.lane.b32.xlu0 %v1979_v49, %s2121_s15 }
 0xf84   : > { %v1158_v50 = vpop.permute.xlu0 %1157 }
 0xf85   : > { %v2466_v51 = vmul.f32 %v1158_v50, %v1142_v42 }
 0xf87   : > { %v1174_v52 = vpack.c.bf16 %v2466_v51, %v2466_v51 }
 0xf89   : > { %1176 = vrot.lane.b32.xlu1 %v1174_v52, %s2122_s17 }
 0xffb   : > { %v1177_v53 = vpop.permute.xlu1 %1176 }
 0xffc   : > { %1809 = vmatmul.mubr.msk.bf16.vlgmr.msra.gmra.mrb[8].mxu1 %vm762_vm2, %v1177_v53 }
 0xffd   : > { %1821 = vmatpush3.bf16.msra.mxu1 %v2375_v3  ;;  %1824 = vmatprep.mubr.msk.bf16.mxu1 %vm2119_vm1, %v2118_v4 }
 0xffe   : > { %1822 = vmatprep.subr.bf16.mxu1 %v2118_v4 }
0x1001   : > { %1823 = vmatpush3.bf16.msra.mxu1 %v2382_v5 }
0x10cf   : > { %v1215_v55 = vpop.f32.mrb[8].mxu1 }
0x10d0   : > { %v1221_v56 = vadd.f32 %v1215_v55, %v1173_v54  ;;  %v1810_v57 = vpop.f32.mrb[9].mxu1 }
0x10d1   : > { %v1218_v58 = vpop.f32.mrb[10].mxu1 }
0x10d2   : > { %1980 = vtanh.f32 %v1221_v56  ;;  %v1811_v59 = vpop.f32.mrb[11].mxu1  ;;  %v1222_v61 = vmul.f32 0.5, %v1221_v56 }
0x10d4   : > { %1982 = vtanh.f32 %v1222_v61 }
0x10dc   : > { %v1981_v60 = vpop.eup %1980 }
0x10dd   : > { %1229 = vrot.lane.b32.xlu0 %v1981_v60, %s2121_s15 }
0x10de   : > { %v1983_v3 = vpop.eup %1982 }
0x10df   : > { %v1224_v62 = vadd.f32 1.0, %v1983_v3 }
0x10e1   : > { %v1225_v63 = vmul.f32 0.5, %v1224_v62 }
0x10e3   : > { %v1227_v4 = vmul.f32 %v1225_v63, %v1154_v48  ;;  %v1663_v48 = vadd.s32 4294967295, %v747_v45 }
0x10e5   : > { %vm834_vm3 = vcmp.eq.s32.totalorder %v1663_v48, 0  ;;  %vm1000_vm4 = vcmp.eq.s32.totalorder %v1663_v48, 2  ;;  %vm1083_vm5 = vcmp.eq.s32.totalorder %v1663_v48, 3  ;;  %vm1249_vm6 = vcmp.eq.s32.totalorder %v1663_v48, 5 }
0x10e6   : > { %v835_v53 = vsel %vm834_vm3, 1, %v2120_v6  ;;  %v1001_v54 = vsel %vm1000_vm4, 1, %v2120_v6  ;;  %v1084_v55 = vsel %vm1083_vm5, 1, %v2120_v6  ;;  %v1250_v56 = vsel %vm1249_vm6, 1, %v2120_v6 }
0x10e7   : > { %vm1415_vm7 = vcmp.eq.s32.totalorder %v1663_v48, 7  ;;  %vm917_vm8 = vcmp.eq.s32.totalorder %v1663_v48, 1  ;;  %vm1166_vm9 = vcmp.eq.s32.totalorder %v1663_v48, 4  ;;  %vm1332_vm10 = vcmp.eq.s32.totalorder %v1663_v48, 6 }
0x10e8   : > { %v1416_v57 = vsel %vm1415_vm7, 1, %v2120_v6  ;;  %v918_v3 = vsel %vm917_vm8, 1, %v2120_v6  ;;  %vm2125_vm4 = vmmov (!%p1673_p5), 0  }
0x114f   : > { %v1230_v1 = vpop.permute.xlu0 %1229 }
0x1150   : > { %v1232_v2 = vmul.f32 %v1230_v1, %v1225_v63 }
0x1152   : > { %1234 = vrot.lane.b32.xlu1 %v1232_v2, %s2122_s17  ;;  %v1333_v2 = vsel %vm1332_vm10, 1, %v2120_v6 }
0x11c4   : > { %v1235_v5 = vpop.permute.xlu1 %1234 }
0x11c5   : > { %v1237_v0 = vadd.f32 %v1235_v5, %v1227_v4 }
0x11c7   : > { %1984 = vtanh.f32 %v1237_v0 }
0x11d1   : > { %v1985_v8 = vpop.eup %1984 }
0x11d2   : > { %1240 = vrot.lane.b32.xlu0 %v1985_v8, %s2121_s15 }
0x1244   : > { %v1241_v9 = vpop.permute.xlu0 %1240 }
0x1245   : > { %v2480_v10 = vmul.f32 %v1241_v9, %v1225_v63  ;;  %v1167_v63 = vsel %vm1166_vm9, 1, %v2120_v6 }
0x1247   : > { %v1257_v11 = vpack.c.bf16 %v2480_v10, %v2480_v10 }
0x1249   : > { %1259 = vrot.lane.b32.xlu1 %v1257_v11, %s2122_s17 }
0x12bb   : > { %v1260_v12 = vpop.permute.xlu1 %1259 }
0x12bc   : > { %1817 = vmatmul.mubr.msk.bf16.vlgmr.msra.gmra.mrb[12].mxu0 %vm762_vm2, %v1260_v12 }
0x138f   : > { %v1298_v14 = vpop.f32.mrb[12].mxu0 }
0x1390   : > { %v1304_v15 = vadd.f32 %v1298_v14, %v1256_v13  ;;  %v1818_v16 = vpop.f32.mrb[13].mxu0 }
0x1391   : > { %v1301_v17 = vpop.f32.mrb[14].mxu0 }
0x1392   : > { %1986 = vtanh.f32 %v1304_v15  ;;  %v1819_v18 = vpop.f32.mrb[15].mxu0  ;;  %v1305_v20 = vmul.f32 0.5, %v1304_v15 }
0x1394   : > { %1988 = vtanh.f32 %v1305_v20 }
0x139c   : > { %v1987_v19 = vpop.eup %1986 }
0x139d   : > { %1312 = vrot.lane.b32.xlu0 %v1987_v19, %s2121_s15 }
0x139e   : > { %v1989_v21 = vpop.eup %1988 }
0x139f   : > { %v1307_v22 = vadd.f32 1.0, %v1989_v21 }
0x13a1   : > { %v1308_v23 = vmul.f32 0.5, %v1307_v22 }
0x13a3   : > { %v1310_v27 = vmul.f32 %v1308_v23, %v1237_v0 }
0x140f   : > { %v1313_v24 = vpop.permute.xlu0 %1312 }
0x1410   : > { %v1315_v26 = vmul.f32 %v1313_v24, %v1308_v23  ;;  %v2123_v24 = vmov (!%p1673_p5), 0.0  }
0x1411   : > { %1828 = vmatprep.subr.bf16.mxu0 (!%p1673_p5), %v2123_v24  ;;  %1832 = vmatprep.mubr.msk.bf16.mxu0 (!%p1673_p5), %vm2125_vm4, %v2123_v24 }
0x1412   : > { %1317 = vrot.lane.b32.xlu1 %v1315_v26, %s2122_s17  ;;  %v1998_v26 = vld [vmem:[#allocation6] sm:$0xff] (!%p1673_p5)  }
0x1413   : > { %1829 = vmatpush3.bf16.msra.mxu0 (!%p1673_p5), %v1998_v26 }
0x1414   : > { %1830 = vmatprep.subr.bf16.mxu0 (!%p1673_p5), %v2123_v24 }
0x1484   : > { %v1318_v28 = vpop.permute.xlu1 %1317 }
0x1485   : > { %v1320_v30 = vadd.f32 %v1318_v28, %v1310_v27  ;;  %v1999_v27 = vld [vmem:[#allocation6 + $0x8] sm:$0xff] (!%p1673_p5)  }
0x1486   : > { %1831 = vmatpush3.bf16.msra.mxu0 (!%p1673_p5), %v1999_v27 }
0x1487   : > { %1990 = vtanh.f32 %v1320_v30 }
0x1491   : > { %v1991_v31 = vpop.eup %1990 }
0x1492   : > { %1323 = vrot.lane.b32.xlu0 %v1991_v31, %s2121_s15 }
0x1504   : > { %v1324_v32 = vpop.permute.xlu0 %1323 }
0x1505   : > { %v2489_v33 = vmul.f32 %v1324_v32, %v1308_v23 }
0x1507   : > { %v1340_v34 = vpack.c.bf16 %v2489_v33, %v2489_v33 }
0x1509   : > { %1342 = vrot.lane.b32.xlu1 %v1340_v34, %s2122_s17 }
0x157b   : > { %v1343_v35 = vpop.permute.xlu1 %1342 }
0x157c   : > { %1825 = vmatmul.mubr.msk.bf16.vlgmr.msra.gmra.mrb[12].mxu1 %vm762_vm2, %v1343_v35 }
0x164f   : > { %v1381_v37 = vpop.f32.mrb[12].mxu1 }
0x1650   : > { %v1387_v38 = vadd.f32 %v1381_v37, %v1339_v36  ;;  %v1826_v39 = vpop.f32.mrb[13].mxu1 }
0x1651   : > { %v1384_v40 = vpop.f32.mrb[14].mxu1 }
0x1652   : > { %1992 = vtanh.f32 %v1387_v38  ;;  %v1827_v41 = vpop.f32.mrb[15].mxu1  ;;  %v1388_v43 = vmul.f32 0.5, %v1387_v38 }
0x1654   : > { %1994 = vtanh.f32 %v1388_v43 }
0x165c   : > { %v1993_v42 = vpop.eup %1992 }
0x165d   : > { %1395 = vrot.lane.b32.xlu0 %v1993_v42, %s2121_s15 }
0x165e   : > { %v1995_v44 = vpop.eup %1994 }
0x165f   : > { %v1390_v47 = vadd.f32 1.0, %v1995_v44 }
0x1661   : > { %v1391_v49 = vmul.f32 0.5, %v1390_v47 }
0x1663   : > { %v1393_v58 = vmul.f32 %v1391_v49, %v1320_v30  ;;  %v1677_v30 = vld [vmem:[%s2572_s7] ss:$0 sm:$0xff] (!%p1673_p5) }
0x16cf   : > { %v1396_v50 = vpop.permute.xlu0 %1395 }
0x16d0   : > { %v1398_v52 = vmul.f32 %v1396_v50, %v1391_v49 }
0x16d2   : > { %1400 = vrot.lane.b32.xlu1 %v1398_v52, %s2122_s17 }
0x16d6   : > { %837 = vperm.xlu1 %1946, %v835_v53  }
0x16da   : > { %1003 = vperm.xlu1 %1946, %v1001_v54  }
0x16de   : > { %1086 = vperm.xlu1 %1946, %v1084_v55  }
0x16e2   : > { %1252 = vperm.xlu1 %1946, %v1250_v56  }
0x16e6   : > { %1418 = vperm.xlu1 %1946, %v1416_v57  }
0x16ea   : > { %913 = vrot.lane.b32.xlu1 %v2422_v46, %s2122_s17 }
0x16ee   : > { %1079 = vrot.lane.b32.xlu1 %v2452_v29, %s2122_s17 }
0x16f2   : > { %1245 = vrot.lane.b32.xlu1 %v2480_v10, %s2122_s17 }
0x1744   : > { %v1401_v59 = vpop.permute.xlu1 %1400 }
0x1745   : > { %v1403_v60 = vadd.f32 %v1401_v59, %v1393_v58 }
0x1747   : > { %1996 = vtanh.f32 %v1403_v60 }
0x1751   : > { %v1997_v61 = vpop.eup %1996 }
0x1752   : > { %1406 = vrot.lane.b32.xlu0 %v1997_v61, %s2121_s15 }
0x1755   : > { %v838_v62 = vpop.permute.xlu1 %837 }
0x1756   : > { %920 = vperm.xlu0 %1947, %v918_v3   ;;  %vm839_vm11 = vcmp.eq.s32.totalorder %v838_v62, 1 }
0x1757   : > { %v840_v14 = vsel %vm839_vm11, %v2407_v25, 0.0 }
0x1759   : > { %v1004_v1 = vpop.permute.xlu1 %1003 }
0x175a   : > { %1169 = vperm.xlu0 %1947, %v1167_v63   ;;  %vm1005_vm12 = vcmp.eq.s32.totalorder %v1004_v1, 1 }
0x175d   : > { %v1087_v4 = vpop.permute.xlu1 %1086 }
0x175e   : > { %1335 = vperm.xlu0 %1947, %v1333_v2   ;;  %vm1088_vm13 = vcmp.eq.s32.totalorder %v1087_v4, 1 }
0x1761   : > { %v1253_v5 = vpop.permute.xlu1 %1252 }
0x1762   : > { %830 = vrot.lane.b32.xlu0 %v2407_v25, %s2122_s17  ;;  %vm1254_vm15 = vcmp.eq.s32.totalorder %v1253_v5, 1 }
0x1765   : > { %v1419_v0 = vpop.permute.xlu1 %1418 }
0x1766   : > { %996 = vrot.lane.b32.xlu0 %v2437_v7, %s2122_s17  ;;  %vm1420_vm1 = vcmp.eq.s32.totalorder %v1419_v0, 1 }
0x1769   : > { %v914_v8 = vpop.permute.xlu1 %913 }
0x176a   : > { %916 = vst.msk [vmem:[#allocation3 + $0x8] sm:$0xff] %vm762_vm2, %v914_v8  ;;  %1162 = vrot.lane.b32.xlu0 %v2466_v51, %s2122_s17 }
0x176d   : > { %v1080_v9 = vpop.permute.xlu1 %1079 }
0x176e   : > { %1082 = vst.msk [vmem:[#allocation3 + $0x18] sm:$0xff] %vm762_vm2, %v1080_v9  ;;  %1328 = vrot.lane.b32.xlu0 %v2489_v33, %s2122_s17 }
0x1771   : > { %v1246_v6 = vpop.permute.xlu1 %1245 }
0x1772   : > { %1248 = vst.msk [vmem:[#allocation3 + $0x28] sm:$0xff] %vm762_vm2, %v1246_v6 }
0x17c4   : > { %v1407_v11 = vpop.permute.xlu0 %1406 }
0x17c5   : > { %v1409_v12 = vmul.f32 %v1407_v11, %v1391_v49 }
0x17c7   : > { %1411 = vrot.lane.b32.xlu1 %v1409_v12, %s2122_s17 }
0x17d5   : > { %v921_v13 = vpop.permute.xlu0 %920 }
0x17d6   : > { %vm922_vm14 = vcmp.eq.s32.totalorder %v921_v13, 1 }
0x17d7   : > { %v923_v15 = vsel %vm922_vm14, %v2422_v46, %v840_v14 }
0x17d8   : > { %v1006_v16 = vsel %vm1005_vm12, %v2437_v7, %v923_v15 }
0x17d9   : > { %v1089_v17 = vsel %vm1088_vm13, %v2452_v29, %v1006_v16  ;;  %v1170_v18 = vpop.permute.xlu0 %1169 }
0x17da   : > { %vm1171_vm0 = vcmp.eq.s32.totalorder %v1170_v18, 1 }
0x17db   : > { %v1172_v19 = vsel %vm1171_vm0, %v2466_v51, %v1089_v17 }
0x17dc   : > { %v1255_v20 = vsel %vm1254_vm15, %v2480_v10, %v1172_v19 }
0x17dd   : > { %v1336_v21 = vpop.permute.xlu0 %1335 }
0x17de   : > { %vm1337_vm3 = vcmp.eq.s32.totalorder %v1336_v21, 1 }
0x17df   : > { %v1338_v25 = vsel %vm1337_vm3, %v2489_v33, %v1255_v20 }
0x17e0   : > { %v1421_v22 = vsel %vm1420_vm1, %v1409_v12, %v1338_v25 }
0x17e1   : > { %v831_v23 = vpop.permute.xlu0 %830  ;;  %v1427_v10 = vpack.c.bf16 (!%p1673_p5), %v1421_v22, %v1421_v22 }
0x17e2   : > { %833 = vst.msk [vmem:[#allocation3] sm:$0xff] %vm762_vm2, %v831_v23 }
0x17e3   : > { %1433 = vrot.lane.b32.xlu0 (!%p1673_p5), %v1427_v10, %s2124_s26 }
0x17e5   : > { %v997_v46 = vpop.permute.xlu0 %996 }
0x17e6   : > { %999 = vst.msk [vmem:[#allocation3 + $0x10] sm:$0xff] %vm762_vm2, %v997_v46 }
0x17e9   : > { %v1163_v7 = vpop.permute.xlu0 %1162 }
0x17ea   : > { %1165 = vst.msk [vmem:[#allocation3 + $0x20] sm:$0xff] %vm762_vm2, %v1163_v7 }
0x17ed   : > { %v1329_v29 = vpop.permute.xlu0 %1328 }
0x17ee   : > { %1331 = vst.msk [vmem:[#allocation3 + $0x30] sm:$0xff] %vm762_vm2, %v1329_v29 }
0x1834   : > { %1425 = sbr.rel (%p1673_p5) target bundleno = 6445 (0x192d), region = 72 }
0x1839   : > { %v1412_v51 = vpop.permute.xlu1 %1411 }
0x183a   : > { %1414 = vst.msk [vmem:[#allocation3 + $0x38] sm:$0xff] %vm762_vm2, %v1412_v51 }
0x1855   : > { %v1434_v28 = vpop.permute.xlu0 %1433 }
0x1856   : > { %1833 = vmatmul.mubr.msk.bf16.vlgmr.msra.gmra.mrb[0].mxu0 %vm762_vm2, %v1434_v28 }
0x1929   : > { %v1484_v31 = vpop.f32.mrb[0].mxu0 }
0x192a   : > { %v1496_v32 = vadd.f32 %v1677_v30, %v1484_v31  ;;  %v1834_v33 = vpop.f32.mrb[1].mxu0 }
0x192b   : > { %v1487_v34 = vpop.f32.mrb[2].mxu0 }
0x192c   : > { %1497 = vst [vmem:[%s2573_s8] sm:$0xff] %v1496_v32  ;;  %v1835_v35 = vpop.f32.mrb[3].mxu0 }
0x192d PF: > { %s22_s10 = sadd.s32 1, %s2112_s10   ;;  %s2588_s27 = smov %s2096_s28 }
0x192e   : > { %p19_p8 = scmp.ge.s32.totalorder %s22_s10, 4   ;;  %s2589_s28 = smov %s2100_s29 }
0x192f   : > { %s2590_s29 = smov %s2257_s24  ;;  %s2591_s30 = smov %s2108_s9 }
0x1930   : > { %s2592_s9 = smov %s2594_s18  ;;  %21 = sbr.rel (!%p19_p8) target bundleno = 5 (0x5), region = 120 }
0x1937   :  { %1517 = vsyncpa [#allocation5], 1 }
0x1938   :  { %1519 = vsyncpa [#allocation5 + $0x1], 1 }
0x1939   :  { %1520 = vsyncpa [#allocation7], 1 }

</bundles_post_ra>
